<compile_context>
chip_gen: v6e
topology: v6e:2x2x1
jax: 0.10.0
libtpu: 0.0.40
codegen_flags: <defaults>
</compile_context>

<pallas_src>
import numpy as np
import jax
import jax.numpy as jnp
from jax.experimental import pallas as pl
from jax.experimental.pallas import tpu as pltpu

# ---------------- problem sizes (small, consistent with the module) -----------
B = 2          # batch
S = 8          # encoder sequence length
H = 32         # dim_hidden (unidirectional encoder)
W = 16         # dim_word
V = 40         # vocab_size
MAX_LEN = 5    # max_len
T = MAX_LEN - 1
VP = 128       # vocab padded to one full lane row (lane-dense stores)


# ------------------------------ Pallas kernel --------------------------------
def decoder_kernel(emb_ref,    # (T*B, W)    target embeddings, t-major rows
                   enc_ref,    # (B, S, H)   encoder outputs
                   h0_ref,     # (B, H)      initial hidden state
                   sqw_ref,    # (8, H, H)   [Wa1_enc, Wa1_hid, Wih_c_r, Wih_c_z,
                               #              Wih_c_n, Whh_r, Whh_z, Whh_n]
                   wihx_ref,   # (3, W, H)   [Wih_x_r, Wih_x_z, Wih_x_n]
                   vec_ref,    # (8, H)      [ba1, wa2, bih_r, bih_z, bih_n,
                               #              bhh_r, bhh_z, bhh_n]
                   wout_ref,   # (H, VP)     output projection (zero-padded cols)
                   bout_ref,   # (1, VP)     output bias (-1e9 in padded cols)
                   out_ref):   # (T*B, VP)   log-probs (t-major rows)
    enc = enc_ref[...]                              # (B, S, H)
    h = h0_ref[...]                                 # (B, H)
    emb = emb_ref[...]                              # (T*B, W)
    vec = vec_ref[...]                              # (8, H)

    wa1_enc = sqw_ref[0]
    wa1_hid = sqw_ref[1]
    wihc_r, wihc_z, wihc_n = sqw_ref[2], sqw_ref[3], sqw_ref[4]
    whh_r, whh_z, whh_n = sqw_ref[5], sqw_ref[6], sqw_ref[7]

    ba1 = vec[0:1, :]                               # (1, H)
    wa2 = vec[1:2, :]                               # (1, H)
    bhh_r, bhh_z, bhh_n = vec[5:6, :], vec[6:7, :], vec[7:8, :]

    # ---- hoisted, time-invariant attention pre-projection -------------------
    e_enc = jnp.einsum('bsh,hd->bsd', enc, wa1_enc,
                       preferred_element_type=jnp.float32) + ba1[None]   # (B,S,H)

    # ---- hoisted, h-independent input-side GRU projections (all timesteps) --
    gix_r = jnp.dot(emb, wihx_ref[0],
                    preferred_element_type=jnp.float32) + vec[2:3, :]    # (T*B,H)
    gix_z = jnp.dot(emb, wihx_ref[1],
                    preferred_element_type=jnp.float32) + vec[3:4, :]
    gix_n = jnp.dot(emb, wihx_ref[2],
                    preferred_element_type=jnp.float32) + vec[4:5, :]

    nb = h.shape[0]
    hs = []
    for t in range(T):                 # fully unrolled recurrence (T static, small)
        # -- additive attention: softmax(wa2 . tanh(e_enc + Wa1_hid h)) -------
        e_hid = jnp.dot(h, wa1_hid, preferred_element_type=jnp.float32)  # (B,H)
        e = jnp.tanh(e_enc + e_hid[:, None, :])                          # (B,S,H)
        scores = jnp.sum(e * wa2[None], axis=-1)                         # (B,S)
        scores = scores - jnp.max(scores, axis=-1, keepdims=True)
        exps = jnp.exp(scores)
        inv = pl.reciprocal(jnp.sum(exps, axis=-1, keepdims=True), approx=True)
        alpha = exps * inv                                               # (B,S)
        ctx = jnp.sum(alpha[:, :, None] * enc, axis=1)                   # (B,H)

        # -- GRU cell (PyTorch gate order r, z, n), per-gate weights ----------
        sl = slice(t * nb, (t + 1) * nb)
        gr = gix_r[sl] + jnp.dot(ctx, wihc_r, preferred_element_type=jnp.float32)
        gz = gix_z[sl] + jnp.dot(ctx, wihc_z, preferred_element_type=jnp.float32)
        gn = gix_n[sl] + jnp.dot(ctx, wihc_n, preferred_element_type=jnp.float32)
        hr = jnp.dot(h, whh_r, preferred_element_type=jnp.float32) + bhh_r
        hz = jnp.dot(h, whh_z, preferred_element_type=jnp.float32) + bhh_z
        hn = jnp.dot(h, whh_n, preferred_element_type=jnp.float32) + bhh_n
        r = jax.nn.sigmoid(gr + hr)
        z = jax.nn.sigmoid(gz + hz)
        n = jnp.tanh(gn + r * hn)
        h = (1.0 - z) * n + z * h                                        # (B,H)
        hs.append(h)

    # ---- batched output projection + log_softmax, one lane-dense store ------
    h_all = jnp.concatenate(hs, axis=0)                                  # (T*B,H)
    logits = jnp.dot(h_all, wout_ref[...],
                     preferred_element_type=jnp.float32) + bout_ref[...] # (T*B,VP)
    m = jnp.max(logits, axis=-1, keepdims=True)
    lse = jnp.log(jnp.sum(jnp.exp(logits - m), axis=-1, keepdims=True)) + m
    out_ref[...] = (logits - lse).astype(out_ref.dtype)


# ------------------------------ wrapper ---------------------------------------
def decoder_rnn_train(targets_emb_btw, encoder_outputs, encoder_hidden, params):
    """targets_emb_btw: (B, MAX_LEN, W); encoder_outputs: (B, S, H);
    encoder_hidden: (1, B, H). Returns seq_logprobs (B, T, V)."""
    # -- layout plumbing: t-major embedding slab, per-gate weight splits -------
    t_emb = jnp.transpose(targets_emb_btw[:, :T, :], (1, 0, 2))      # (T, B, W)
    emb2d = t_emb.reshape(T * B, W)                                  # row = t*B + b
    h0 = encoder_hidden[0]                                           # (B, H)

    wa1 = params['w_a1']                                             # (2H, H)
    wih = params['w_ih']                                             # (W+H, 3H)
    whh = params['w_hh']                                             # (H, 3H)
    wih_x = wih[:W, :]
    wih_c = wih[W:, :]

    sq_w = jnp.stack(
        [wa1[:H, :], wa1[H:, :]]
        + [wih_c[:, g * H:(g + 1) * H] for g in range(3)]
        + [whh[:, g * H:(g + 1) * H] for g in range(3)], axis=0)     # (8, H, H)
    wih_x_g = jnp.stack(
        [wih_x[:, g * H:(g + 1) * H] for g in range(3)], axis=0)     # (3, W, H)
    vec_p = jnp.stack(
        [params['b_a1'][0], params['w_a2'][0]]
        + [params['b_ih'][0, g * H:(g + 1) * H] for g in range(3)]
        + [params['b_hh'][0, g * H:(g + 1) * H] for g in range(3)], axis=0)  # (8, H)

    wout_p = jnp.zeros((H, VP), jnp.float32).at[:, :V].set(params['w_out'])
    bout_p = jnp.full((1, VP), -1e9, jnp.float32).at[:, :V].set(params['b_out'])

    out_2d = pl.pallas_call(
        decoder_kernel,
        out_shape=jax.ShapeDtypeStruct((T * B, VP), jnp.float32),
        grid_spec=pltpu.PrefetchScalarGridSpec(
            num_scalar_prefetch=0,
            grid=(1,),
            in_specs=[
                pl.BlockSpec((T * B, W), lambda i: (0, 0)),
                pl.BlockSpec((B, S, H), lambda i: (0, 0, 0)),
                pl.BlockSpec((B, H), lambda i: (0, 0)),
                pl.BlockSpec((8, H, H), lambda i: (0, 0, 0)),
                pl.BlockSpec((3, W, H), lambda i: (0, 0, 0)),
                pl.BlockSpec((8, H), lambda i: (0, 0)),
                pl.BlockSpec((H, VP), lambda i: (0, 0)),
                pl.BlockSpec((1, VP), lambda i: (0, 0)),
            ],
            out_specs=pl.BlockSpec((T * B, VP), lambda i: (0, 0)),
        ),
        compiler_params=pltpu.CompilerParams(
            dimension_semantics=("arbitrary",)),
    )(emb2d, encoder_outputs, h0, sq_w, wih_x_g, vec_p, wout_p, bout_p)

    out = out_2d.reshape(T, B, VP)[:, :, :V]                         # (T, B, V)
    return jnp.transpose(out, (1, 0, 2))                             # (B, T, V)


# ------------------------------ pure-JAX reference ----------------------------
def decoder_rnn_reference(targets_emb_btw, encoder_outputs, encoder_hidden, p):
    h = encoder_hidden[0]
    outs = []
    for i in range(T):
        x_w = targets_emb_btw[:, i, :]
        e = jnp.tanh(jnp.einsum('bsh,hd->bsd', encoder_outputs, p['w_a1'][:H, :])
                     + (h @ p['w_a1'][H:, :])[:, None, :] + p['b_a1'][None])
        scores = jnp.sum(e * p['w_a2'][None], axis=-1)
        alpha = jax.nn.softmax(scores, axis=-1)
        context = jnp.sum(alpha[:, :, None] * encoder_outputs, axis=1)
        x = jnp.concatenate([x_w, context], axis=-1)
        gi = x @ p['w_ih'] + p['b_ih']
        gh = h @ p['w_hh'] + p['b_hh']
        r = jax.nn.sigmoid(gi[:, :H] + gh[:, :H])
        z = jax.nn.sigmoid(gi[:, H:2 * H] + gh[:, H:2 * H])
        n = jnp.tanh(gi[:, 2 * H:] + r * gh[:, 2 * H:])
        h = (1.0 - z) * n + z * h
        logits = h @ p['w_out'] + p['b_out']
        outs.append(jax.nn.log_softmax(logits, axis=-1))
    return jnp.stack(outs, axis=1)


# ------------------------------ main -------------------------------------------
if __name__ == "__main__":
    key = jax.random.PRNGKey(0)
    ks = jax.random.split(key, 16)

    # deterministic parameter init (shapes from DecoderRNN.__init__)
    scale = 0.1
    params = {
        'emb_table': scale * jax.random.normal(ks[0], (V, W), jnp.float32),
        'w_a1':      scale * jax.random.normal(ks[1], (2 * H, H), jnp.float32),
        'b_a1':      scale * jax.random.normal(ks[2], (1, H), jnp.float32),
        'w_a2':      scale * jax.random.normal(ks[3], (1, H), jnp.float32),
        'w_ih':      scale * jax.random.normal(ks[4], (W + H, 3 * H), jnp.float32),
        'w_hh':      scale * jax.random.normal(ks[5], (H, 3 * H), jnp.float32),
        'b_ih':      scale * jax.random.normal(ks[6], (1, 3 * H), jnp.float32),
        'b_hh':      scale * jax.random.normal(ks[7], (1, 3 * H), jnp.float32),
        'w_out':     scale * jax.random.normal(ks[8], (H, V), jnp.float32),
        'b_out':     scale * jax.random.normal(ks[9], (1, V), jnp.float32),
    }

    # example inputs
    encoder_outputs = jax.random.normal(ks[10], (B, S, H), jnp.float32)
    encoder_hidden = jax.random.normal(ks[11], (1, B, H), jnp.float32)
    targets = jax.random.randint(ks[12], (B, MAX_LEN), 0, V, jnp.int32)

    # embedding lookup (glue, plain JAX gather)
    targets_emb = params['emb_table'][targets]          # (B, MAX_LEN, W)

    seq_logprobs = decoder_rnn_train(targets_emb, encoder_outputs,
                                     encoder_hidden, params)
    seq_logprobs = jax.block_until_ready(seq_logprobs)
    # seq_preds is [] in train mode (matches the PyTorch module)
    seq_preds = []

    ref = decoder_rnn_reference(targets_emb, encoder_outputs,
                                encoder_hidden, params)
    assert seq_logprobs.shape == (B, T, V)
    np.testing.assert_allclose(np.asarray(seq_logprobs), np.asarray(ref),
                               rtol=2e-2, atol=2e-2)
    print("KERNEL_OK")
</pallas_src>

<mosaic_0001>
module attributes {stable_mosaic.version = 11 : i64} {
  func.func @decoder_kernel(%arg0: i32, %arg1: memref<8x16xf32, #tpu.memory_space<vmem>>, %arg2: memref<2x8x32xf32, #tpu.memory_space<vmem>>, %arg3: memref<2x32xf32, #tpu.memory_space<vmem>>, %arg4: memref<8x32x32xf32, #tpu.memory_space<vmem>>, %arg5: memref<3x16x32xf32, #tpu.memory_space<vmem>>, %arg6: memref<8x32xf32, #tpu.memory_space<vmem>>, %arg7: memref<32x128xf32, #tpu.memory_space<vmem>>, %arg8: memref<1x128xf32, #tpu.memory_space<vmem>>, %arg9: memref<8x128xf32, #tpu.memory_space<vmem>>) attributes {dimension_semantics = [#tpu.dimension_semantics<arbitrary>], iteration_bounds = array<i64: 1>, scalar_prefetch = 0 : i64, scratch_operands = 0 : i64, tpu.core_type = #tpu.core_type<tc>, window_params = [{pipeline_mode = #tpu.pipeline_mode<synchronous>, transform_indices = @transform_0, window_bounds = array<i64: 8, 16>}, {pipeline_mode = #tpu.pipeline_mode<synchronous>, transform_indices = @transform_1, window_bounds = array<i64: 2, 8, 32>}, {pipeline_mode = #tpu.pipeline_mode<synchronous>, transform_indices = @transform_2, window_bounds = array<i64: 2, 32>}, {pipeline_mode = #tpu.pipeline_mode<synchronous>, transform_indices = @transform_3, window_bounds = array<i64: 8, 32, 32>}, {pipeline_mode = #tpu.pipeline_mode<synchronous>, transform_indices = @transform_4, window_bounds = array<i64: 3, 16, 32>}, {pipeline_mode = #tpu.pipeline_mode<synchronous>, transform_indices = @transform_5, window_bounds = array<i64: 8, 32>}, {pipeline_mode = #tpu.pipeline_mode<synchronous>, transform_indices = @transform_6, window_bounds = array<i64: 32, 128>}, {pipeline_mode = #tpu.pipeline_mode<synchronous>, transform_indices = @transform_7, window_bounds = array<i64: 1, 128>}, {pipeline_mode = #tpu.pipeline_mode<synchronous>, transform_indices = @transform_8, window_bounds = array<i64: 8, 128>}]} {
    %c0 = arith.constant 0 : index
    %c0_0 = arith.constant 0 : index
    %c0_1 = arith.constant 0 : index
    %0 = vector.load %arg2[%c0, %c0_0, %c0_1] : memref<2x8x32xf32, #tpu.memory_space<vmem>>, vector<2x8x32xf32>
    %c0_2 = arith.constant 0 : index
    %c0_3 = arith.constant 0 : index
    %1 = vector.load %arg3[%c0_2, %c0_3] : memref<2x32xf32, #tpu.memory_space<vmem>>, vector<2x32xf32>
    %c0_4 = arith.constant 0 : index
    %c0_5 = arith.constant 0 : index
    %2 = vector.load %arg1[%c0_4, %c0_5] : memref<8x16xf32, #tpu.memory_space<vmem>>, vector<8x16xf32>
    %c0_6 = arith.constant 0 : index
    %c0_7 = arith.constant 0 : index
    %3 = vector.load %arg6[%c0_6, %c0_7] : memref<8x32xf32, #tpu.memory_space<vmem>>, vector<8x32xf32>
    %c0_8 = arith.constant 0 : index
    %c0_9 = arith.constant 0 : index
    %c0_10 = arith.constant 0 : index
    %4 = vector.load %arg4[%c0_8, %c0_9, %c0_10] : memref<8x32x32xf32, #tpu.memory_space<vmem>>, vector<1x32x32xf32>
    %5 = vector.shape_cast %4 : vector<1x32x32xf32> to vector<32x32xf32>
    %c1 = arith.constant 1 : index
    %c0_11 = arith.constant 0 : index
    %c0_12 = arith.constant 0 : index
    %6 = vector.load %arg4[%c1, %c0_11, %c0_12] : memref<8x32x32xf32, #tpu.memory_space<vmem>>, vector<1x32x32xf32>
    %7 = vector.shape_cast %6 : vector<1x32x32xf32> to vector<32x32xf32>
    %c2 = arith.constant 2 : index
    %c0_13 = arith.constant 0 : index
    %c0_14 = arith.constant 0 : index
    %8 = vector.load %arg4[%c2, %c0_13, %c0_14] : memref<8x32x32xf32, #tpu.memory_space<vmem>>, vector<1x32x32xf32>
    %9 = vector.shape_cast %8 : vector<1x32x32xf32> to vector<32x32xf32>
    %c3 = arith.constant 3 : index
    %c0_15 = arith.constant 0 : index
    %c0_16 = arith.constant 0 : index
    %10 = vector.load %arg4[%c3, %c0_15, %c0_16] : memref<8x32x32xf32, #tpu.memory_space<vmem>>, vector<1x32x32xf32>
    %11 = vector.shape_cast %10 : vector<1x32x32xf32> to vector<32x32xf32>
    %c4 = arith.constant 4 : index
    %c0_17 = arith.constant 0 : index
    %c0_18 = arith.constant 0 : index
    %12 = vector.load %arg4[%c4, %c0_17, %c0_18] : memref<8x32x32xf32, #tpu.memory_space<vmem>>, vector<1x32x32xf32>
    %13 = vector.shape_cast %12 : vector<1x32x32xf32> to vector<32x32xf32>
    %c5 = arith.constant 5 : index
    %c0_19 = arith.constant 0 : index
    %c0_20 = arith.constant 0 : index
    %14 = vector.load %arg4[%c5, %c0_19, %c0_20] : memref<8x32x32xf32, #tpu.memory_space<vmem>>, vector<1x32x32xf32>
    %15 = vector.shape_cast %14 : vector<1x32x32xf32> to vector<32x32xf32>
    %c6 = arith.constant 6 : index
    %c0_21 = arith.constant 0 : index
    %c0_22 = arith.constant 0 : index
    %16 = vector.load %arg4[%c6, %c0_21, %c0_22] : memref<8x32x32xf32, #tpu.memory_space<vmem>>, vector<1x32x32xf32>
    %17 = vector.shape_cast %16 : vector<1x32x32xf32> to vector<32x32xf32>
    %c7 = arith.constant 7 : index
    %c0_23 = arith.constant 0 : index
    %c0_24 = arith.constant 0 : index
    %18 = vector.load %arg4[%c7, %c0_23, %c0_24] : memref<8x32x32xf32, #tpu.memory_space<vmem>>, vector<1x32x32xf32>
    %19 = vector.shape_cast %18 : vector<1x32x32xf32> to vector<32x32xf32>
    %20 = vector.extract_strided_slice %3 {offsets = [0, 0], sizes = [1, 32], strides = [1, 1]} : vector<8x32xf32> to vector<1x32xf32>
    %21 = vector.extract_strided_slice %3 {offsets = [1, 0], sizes = [1, 32], strides = [1, 1]} : vector<8x32xf32> to vector<1x32xf32>
    %22 = vector.extract_strided_slice %3 {offsets = [5, 0], sizes = [1, 32], strides = [1, 1]} : vector<8x32xf32> to vector<1x32xf32>
    %23 = vector.extract_strided_slice %3 {offsets = [6, 0], sizes = [1, 32], strides = [1, 1]} : vector<8x32xf32> to vector<1x32xf32>
    %24 = vector.extract_strided_slice %3 {offsets = [7, 0], sizes = [1, 32], strides = [1, 1]} : vector<8x32xf32> to vector<1x32xf32>
    "tpu.trace_start"() <{level = 10 : i32, message = "bsh,hd->bsd"}> : () -> ()
    %cst = arith.constant dense<0.000000e+00> : vector<2x8x32xf32>
    %25 = tpu.matmul %0, %5, %cst {dimension_numbers = #tpu.dot_dimension_numbers<[2], [0], [0, 1], [1], [0, 0, 0, 1, 1, 1], [], []>} : vector<2x8x32xf32>, vector<32x32xf32>, vector<2x8x32xf32> -> vector<2x8x32xf32>
    "tpu.trace_stop"() : () -> ()
    %26 = vector.shape_cast %20 : vector<1x32xf32> to vector<1x1x32xf32>
    %27 = vector.broadcast %26 : vector<1x1x32xf32> to vector<2x8x32xf32>
    %28 = arith.addf %25, %27 : vector<2x8x32xf32>
    %c0_25 = arith.constant 0 : index
    %c0_26 = arith.constant 0 : index
    %c0_27 = arith.constant 0 : index
    %29 = vector.load %arg5[%c0_25, %c0_26, %c0_27] : memref<3x16x32xf32, #tpu.memory_space<vmem>>, vector<1x16x32xf32>
    %30 = vector.shape_cast %29 : vector<1x16x32xf32> to vector<16x32xf32>
    %cst_28 = arith.constant dense<0.000000e+00> : vector<8x32xf32>
    %31 = tpu.matmul %2, %30, %cst_28 {dimension_numbers = #tpu.dot_dimension_numbers<[1], [0], [0], [1], [0, 0, 1, 1], [], []>} : vector<8x16xf32>, vector<16x32xf32>, vector<8x32xf32> -> vector<8x32xf32>
    %32 = vector.extract_strided_slice %3 {offsets = [2, 0], sizes = [1, 32], strides = [1, 1]} : vector<8x32xf32> to vector<1x32xf32>
    %33 = vector.broadcast %32 : vector<1x32xf32> to vector<8x32xf32>
    %34 = arith.addf %31, %33 : vector<8x32xf32>
    %c1_29 = arith.constant 1 : index
    %c0_30 = arith.constant 0 : index
    %c0_31 = arith.constant 0 : index
    %35 = vector.load %arg5[%c1_29, %c0_30, %c0_31] : memref<3x16x32xf32, #tpu.memory_space<vmem>>, vector<1x16x32xf32>
    %36 = vector.shape_cast %35 : vector<1x16x32xf32> to vector<16x32xf32>
    %cst_32 = arith.constant dense<0.000000e+00> : vector<8x32xf32>
    %37 = tpu.matmul %2, %36, %cst_32 {dimension_numbers = #tpu.dot_dimension_numbers<[1], [0], [0], [1], [0, 0, 1, 1], [], []>} : vector<8x16xf32>, vector<16x32xf32>, vector<8x32xf32> -> vector<8x32xf32>
    %38 = vector.extract_strided_slice %3 {offsets = [3, 0], sizes = [1, 32], strides = [1, 1]} : vector<8x32xf32> to vector<1x32xf32>
    %39 = vector.broadcast %38 : vector<1x32xf32> to vector<8x32xf32>
    %40 = arith.addf %37, %39 : vector<8x32xf32>
    %c2_33 = arith.constant 2 : index
    %c0_34 = arith.constant 0 : index
    %c0_35 = arith.constant 0 : index
    %41 = vector.load %arg5[%c2_33, %c0_34, %c0_35] : memref<3x16x32xf32, #tpu.memory_space<vmem>>, vector<1x16x32xf32>
    %42 = vector.shape_cast %41 : vector<1x16x32xf32> to vector<16x32xf32>
    %cst_36 = arith.constant dense<0.000000e+00> : vector<8x32xf32>
    %43 = tpu.matmul %2, %42, %cst_36 {dimension_numbers = #tpu.dot_dimension_numbers<[1], [0], [0], [1], [0, 0, 1, 1], [], []>} : vector<8x16xf32>, vector<16x32xf32>, vector<8x32xf32> -> vector<8x32xf32>
    %44 = vector.extract_strided_slice %3 {offsets = [4, 0], sizes = [1, 32], strides = [1, 1]} : vector<8x32xf32> to vector<1x32xf32>
    %45 = vector.broadcast %44 : vector<1x32xf32> to vector<8x32xf32>
    %46 = arith.addf %43, %45 : vector<8x32xf32>
    %cst_37 = arith.constant dense<0.000000e+00> : vector<2x32xf32>
    %47 = tpu.matmul %1, %7, %cst_37 {dimension_numbers = #tpu.dot_dimension_numbers<[1], [0], [0], [1], [0, 0, 1, 1], [], []>} : vector<2x32xf32>, vector<32x32xf32>, vector<2x32xf32> -> vector<2x32xf32>
    %48 = vector.shape_cast %47 : vector<2x32xf32> to vector<2x1x32xf32>
    %49 = vector.broadcast %48 : vector<2x1x32xf32> to vector<2x8x32xf32>
    %50 = arith.addf %28, %49 : vector<2x8x32xf32>
    %51 = math.tanh %50 : vector<2x8x32xf32>
    %52 = vector.shape_cast %21 : vector<1x32xf32> to vector<1x1x32xf32>
    %53 = vector.broadcast %52 : vector<1x1x32xf32> to vector<2x8x32xf32>
    %54 = arith.mulf %51, %53 : vector<2x8x32xf32>
    %cst_38 = arith.constant dense<0.000000e+00> : vector<2x8xf32>
    %55 = vector.multi_reduction <add>, %54, %cst_38 [2] : vector<2x8x32xf32> to vector<2x8xf32>
    %cst_39 = arith.constant dense<0xFF800000> : vector<2xf32>
    %56 = vector.multi_reduction <maximumf>, %55, %cst_39 [1] : vector<2x8xf32> to vector<2xf32>
    %57 = vector.shape_cast %56 : vector<2xf32> to vector<2x1xf32>
    %58 = vector.broadcast %57 : vector<2x1xf32> to vector<2x8xf32>
    %59 = arith.subf %55, %58 : vector<2x8xf32>
    %60 = math.exp %59 : vector<2x8xf32>
    %cst_40 = arith.constant dense<0.000000e+00> : vector<2xf32>
    %61 = vector.multi_reduction <add>, %60, %cst_40 [1] : vector<2x8xf32> to vector<2xf32>
    %62 = vector.shape_cast %61 : vector<2xf32> to vector<2x1xf32>
    %63 = tpu.reciprocal %62 {approx = true} : vector<2x1xf32> -> vector<2x1xf32>
    %64 = vector.broadcast %63 : vector<2x1xf32> to vector<2x8xf32>
    %65 = arith.mulf %60, %64 : vector<2x8xf32>
    %66 = vector.shape_cast %65 : vector<2x8xf32> to vector<2x8x1xf32>
    %67 = vector.broadcast %66 : vector<2x8x1xf32> to vector<2x8x32xf32>
    %68 = arith.mulf %67, %0 : vector<2x8x32xf32>
    %cst_41 = arith.constant dense<0.000000e+00> : vector<2x32xf32>
    %69 = vector.multi_reduction <add>, %68, %cst_41 [1] : vector<2x8x32xf32> to vector<2x32xf32>
    %70 = vector.extract_strided_slice %34 {offsets = [0, 0], sizes = [2, 32], strides = [1, 1]} : vector<8x32xf32> to vector<2x32xf32>
    %cst_42 = arith.constant dense<0.000000e+00> : vector<2x32xf32>
    %71 = tpu.matmul %69, %9, %cst_42 {dimension_numbers = #tpu.dot_dimension_numbers<[1], [0], [0], [1], [0, 0, 1, 1], [], []>} : vector<2x32xf32>, vector<32x32xf32>, vector<2x32xf32> -> vector<2x32xf32>
    %72 = arith.addf %70, %71 : vector<2x32xf32>
    %73 = vector.extract_strided_slice %40 {offsets = [0, 0], sizes = [2, 32], strides = [1, 1]} : vector<8x32xf32> to vector<2x32xf32>
    %cst_43 = arith.constant dense<0.000000e+00> : vector<2x32xf32>
    %74 = tpu.matmul %69, %11, %cst_43 {dimension_numbers = #tpu.dot_dimension_numbers<[1], [0], [0], [1], [0, 0, 1, 1], [], []>} : vector<2x32xf32>, vector<32x32xf32>, vector<2x32xf32> -> vector<2x32xf32>
    %75 = arith.addf %73, %74 : vector<2x32xf32>
    %76 = vector.extract_strided_slice %46 {offsets = [0, 0], sizes = [2, 32], strides = [1, 1]} : vector<8x32xf32> to vector<2x32xf32>
    %cst_44 = arith.constant dense<0.000000e+00> : vector<2x32xf32>
    %77 = tpu.matmul %69, %13, %cst_44 {dimension_numbers = #tpu.dot_dimension_numbers<[1], [0], [0], [1], [0, 0, 1, 1], [], []>} : vector<2x32xf32>, vector<32x32xf32>, vector<2x32xf32> -> vector<2x32xf32>
    %78 = arith.addf %76, %77 : vector<2x32xf32>
    %cst_45 = arith.constant dense<0.000000e+00> : vector<2x32xf32>
    %79 = tpu.matmul %1, %15, %cst_45 {dimension_numbers = #tpu.dot_dimension_numbers<[1], [0], [0], [1], [0, 0, 1, 1], [], []>} : vector<2x32xf32>, vector<32x32xf32>, vector<2x32xf32> -> vector<2x32xf32>
    %80 = vector.broadcast %22 : vector<1x32xf32> to vector<2x32xf32>
    %81 = arith.addf %79, %80 : vector<2x32xf32>
    %cst_46 = arith.constant dense<0.000000e+00> : vector<2x32xf32>
    %82 = tpu.matmul %1, %17, %cst_46 {dimension_numbers = #tpu.dot_dimension_numbers<[1], [0], [0], [1], [0, 0, 1, 1], [], []>} : vector<2x32xf32>, vector<32x32xf32>, vector<2x32xf32> -> vector<2x32xf32>
    %83 = vector.broadcast %23 : vector<1x32xf32> to vector<2x32xf32>
    %84 = arith.addf %82, %83 : vector<2x32xf32>
    %cst_47 = arith.constant dense<0.000000e+00> : vector<2x32xf32>
    %85 = tpu.matmul %1, %19, %cst_47 {dimension_numbers = #tpu.dot_dimension_numbers<[1], [0], [0], [1], [0, 0, 1, 1], [], []>} : vector<2x32xf32>, vector<32x32xf32>, vector<2x32xf32> -> vector<2x32xf32>
    %86 = vector.broadcast %24 : vector<1x32xf32> to vector<2x32xf32>
    %87 = arith.addf %85, %86 : vector<2x32xf32>
    %88 = arith.addf %72, %81 : vector<2x32xf32>
    %89 = arith.negf %88 : vector<2x32xf32>
    %90 = math.exp %89 : vector<2x32xf32>
    %cst_48 = arith.constant 1.000000e+00 : f32
    %91 = vector.broadcast %cst_48 : f32 to vector<2x32xf32>
    %92 = arith.addf %91, %90 : vector<2x32xf32>
    %93 = arith.divf %91, %92 : vector<2x32xf32>
    %94 = arith.addf %75, %84 : vector<2x32xf32>
    %95 = arith.negf %94 : vector<2x32xf32>
    %96 = math.exp %95 : vector<2x32xf32>
    %cst_49 = arith.constant 1.000000e+00 : f32
    %97 = vector.broadcast %cst_49 : f32 to vector<2x32xf32>
    %98 = arith.addf %97, %96 : vector<2x32xf32>
    %99 = arith.divf %97, %98 : vector<2x32xf32>
    %100 = arith.mulf %93, %87 : vector<2x32xf32>
    %101 = arith.addf %78, %100 : vector<2x32xf32>
    %102 = math.tanh %101 : vector<2x32xf32>
    %cst_50 = arith.constant 1.000000e+00 : f32
    %103 = vector.broadcast %cst_50 : f32 to vector<2x32xf32>
    %104 = arith.subf %103, %99 : vector<2x32xf32>
    %105 = arith.mulf %104, %102 : vector<2x32xf32>
    %106 = arith.mulf %99, %1 : vector<2x32xf32>
    %107 = arith.addf %105, %106 : vector<2x32xf32>
    %cst_51 = arith.constant dense<0.000000e+00> : vector<2x32xf32>
    %108 = tpu.matmul %107, %7, %cst_51 {dimension_numbers = #tpu.dot_dimension_numbers<[1], [0], [0], [1], [0, 0, 1, 1], [], []>} : vector<2x32xf32>, vector<32x32xf32>, vector<2x32xf32> -> vector<2x32xf32>
    %109 = vector.shape_cast %108 : vector<2x32xf32> to vector<2x1x32xf32>
    %110 = vector.broadcast %109 : vector<2x1x32xf32> to vector<2x8x32xf32>
    %111 = arith.addf %28, %110 : vector<2x8x32xf32>
    %112 = math.tanh %111 : vector<2x8x32xf32>
    %113 = vector.shape_cast %21 : vector<1x32xf32> to vector<1x1x32xf32>
    %114 = vector.broadcast %113 : vector<1x1x32xf32> to vector<2x8x32xf32>
    %115 = arith.mulf %112, %114 : vector<2x8x32xf32>
    %cst_52 = arith.constant dense<0.000000e+00> : vector<2x8xf32>
    %116 = vector.multi_reduction <add>, %115, %cst_52 [2] : vector<2x8x32xf32> to vector<2x8xf32>
    %cst_53 = arith.constant dense<0xFF800000> : vector<2xf32>
    %117 = vector.multi_reduction <maximumf>, %116, %cst_53 [1] : vector<2x8xf32> to vector<2xf32>
    %118 = vector.shape_cast %117 : vector<2xf32> to vector<2x1xf32>
    %119 = vector.broadcast %118 : vector<2x1xf32> to vector<2x8xf32>
    %120 = arith.subf %116, %119 : vector<2x8xf32>
    %121 = math.exp %120 : vector<2x8xf32>
    %cst_54 = arith.constant dense<0.000000e+00> : vector<2xf32>
    %122 = vector.multi_reduction <add>, %121, %cst_54 [1] : vector<2x8xf32> to vector<2xf32>
    %123 = vector.shape_cast %122 : vector<2xf32> to vector<2x1xf32>
    %124 = tpu.reciprocal %123 {approx = true} : vector<2x1xf32> -> vector<2x1xf32>
    %125 = vector.broadcast %124 : vector<2x1xf32> to vector<2x8xf32>
    %126 = arith.mulf %121, %125 : vector<2x8xf32>
    %127 = vector.shape_cast %126 : vector<2x8xf32> to vector<2x8x1xf32>
    %128 = vector.broadcast %127 : vector<2x8x1xf32> to vector<2x8x32xf32>
    %129 = arith.mulf %128, %0 : vector<2x8x32xf32>
    %cst_55 = arith.constant dense<0.000000e+00> : vector<2x32xf32>
    %130 = vector.multi_reduction <add>, %129, %cst_55 [1] : vector<2x8x32xf32> to vector<2x32xf32>
    %131 = vector.extract_strided_slice %34 {offsets = [2, 0], sizes = [2, 32], strides = [1, 1]} : vector<8x32xf32> to vector<2x32xf32>
    %cst_56 = arith.constant dense<0.000000e+00> : vector<2x32xf32>
    %132 = tpu.matmul %130, %9, %cst_56 {dimension_numbers = #tpu.dot_dimension_numbers<[1], [0], [0], [1], [0, 0, 1, 1], [], []>} : vector<2x32xf32>, vector<32x32xf32>, vector<2x32xf32> -> vector<2x32xf32>
    %133 = arith.addf %131, %132 : vector<2x32xf32>
    %134 = vector.extract_strided_slice %40 {offsets = [2, 0], sizes = [2, 32], strides = [1, 1]} : vector<8x32xf32> to vector<2x32xf32>
    %cst_57 = arith.constant dense<0.000000e+00> : vector<2x32xf32>
    %135 = tpu.matmul %130, %11, %cst_57 {dimension_numbers = #tpu.dot_dimension_numbers<[1], [0], [0], [1], [0, 0, 1, 1], [], []>} : vector<2x32xf32>, vector<32x32xf32>, vector<2x32xf32> -> vector<2x32xf32>
    %136 = arith.addf %134, %135 : vector<2x32xf32>
    %137 = vector.extract_strided_slice %46 {offsets = [2, 0], sizes = [2, 32], strides = [1, 1]} : vector<8x32xf32> to vector<2x32xf32>
    %cst_58 = arith.constant dense<0.000000e+00> : vector<2x32xf32>
    %138 = tpu.matmul %130, %13, %cst_58 {dimension_numbers = #tpu.dot_dimension_numbers<[1], [0], [0], [1], [0, 0, 1, 1], [], []>} : vector<2x32xf32>, vector<32x32xf32>, vector<2x32xf32> -> vector<2x32xf32>
    %139 = arith.addf %137, %138 : vector<2x32xf32>
    %cst_59 = arith.constant dense<0.000000e+00> : vector<2x32xf32>
    %140 = tpu.matmul %107, %15, %cst_59 {dimension_numbers = #tpu.dot_dimension_numbers<[1], [0], [0], [1], [0, 0, 1, 1], [], []>} : vector<2x32xf32>, vector<32x32xf32>, vector<2x32xf32> -> vector<2x32xf32>
    %141 = vector.broadcast %22 : vector<1x32xf32> to vector<2x32xf32>
    %142 = arith.addf %140, %141 : vector<2x32xf32>
    %cst_60 = arith.constant dense<0.000000e+00> : vector<2x32xf32>
    %143 = tpu.matmul %107, %17, %cst_60 {dimension_numbers = #tpu.dot_dimension_numbers<[1], [0], [0], [1], [0, 0, 1, 1], [], []>} : vector<2x32xf32>, vector<32x32xf32>, vector<2x32xf32> -> vector<2x32xf32>
    %144 = vector.broadcast %23 : vector<1x32xf32> to vector<2x32xf32>
    %145 = arith.addf %143, %144 : vector<2x32xf32>
    %cst_61 = arith.constant dense<0.000000e+00> : vector<2x32xf32>
    %146 = tpu.matmul %107, %19, %cst_61 {dimension_numbers = #tpu.dot_dimension_numbers<[1], [0], [0], [1], [0, 0, 1, 1], [], []>} : vector<2x32xf32>, vector<32x32xf32>, vector<2x32xf32> -> vector<2x32xf32>
    %147 = vector.broadcast %24 : vector<1x32xf32> to vector<2x32xf32>
    %148 = arith.addf %146, %147 : vector<2x32xf32>
    %149 = arith.addf %133, %142 : vector<2x32xf32>
    %150 = arith.negf %149 : vector<2x32xf32>
    %151 = math.exp %150 : vector<2x32xf32>
    %cst_62 = arith.constant 1.000000e+00 : f32
    %152 = vector.broadcast %cst_62 : f32 to vector<2x32xf32>
    %153 = arith.addf %152, %151 : vector<2x32xf32>
    %154 = arith.divf %152, %153 : vector<2x32xf32>
    %155 = arith.addf %136, %145 : vector<2x32xf32>
    %156 = arith.negf %155 : vector<2x32xf32>
    %157 = math.exp %156 : vector<2x32xf32>
    %cst_63 = arith.constant 1.000000e+00 : f32
    %158 = vector.broadcast %cst_63 : f32 to vector<2x32xf32>
    %159 = arith.addf %158, %157 : vector<2x32xf32>
    %160 = arith.divf %158, %159 : vector<2x32xf32>
    %161 = arith.mulf %154, %148 : vector<2x32xf32>
    %162 = arith.addf %139, %161 : vector<2x32xf32>
    %163 = math.tanh %162 : vector<2x32xf32>
    %cst_64 = arith.constant 1.000000e+00 : f32
    %164 = vector.broadcast %cst_64 : f32 to vector<2x32xf32>
    %165 = arith.subf %164, %160 : vector<2x32xf32>
    %166 = arith.mulf %165, %163 : vector<2x32xf32>
    %167 = arith.mulf %160, %107 : vector<2x32xf32>
    %168 = arith.addf %166, %167 : vector<2x32xf32>
    %cst_65 = arith.constant dense<0.000000e+00> : vector<2x32xf32>
    %169 = tpu.matmul %168, %7, %cst_65 {dimension_numbers = #tpu.dot_dimension_numbers<[1], [0], [0], [1], [0, 0, 1, 1], [], []>} : vector<2x32xf32>, vector<32x32xf32>, vector<2x32xf32> -> vector<2x32xf32>
    %170 = vector.shape_cast %169 : vector<2x32xf32> to vector<2x1x32xf32>
    %171 = vector.broadcast %170 : vector<2x1x32xf32> to vector<2x8x32xf32>
    %172 = arith.addf %28, %171 : vector<2x8x32xf32>
    %173 = math.tanh %172 : vector<2x8x32xf32>
    %174 = vector.shape_cast %21 : vector<1x32xf32> to vector<1x1x32xf32>
    %175 = vector.broadcast %174 : vector<1x1x32xf32> to vector<2x8x32xf32>
    %176 = arith.mulf %173, %175 : vector<2x8x32xf32>
    %cst_66 = arith.constant dense<0.000000e+00> : vector<2x8xf32>
    %177 = vector.multi_reduction <add>, %176, %cst_66 [2] : vector<2x8x32xf32> to vector<2x8xf32>
    %cst_67 = arith.constant dense<0xFF800000> : vector<2xf32>
    %178 = vector.multi_reduction <maximumf>, %177, %cst_67 [1] : vector<2x8xf32> to vector<2xf32>
    %179 = vector.shape_cast %178 : vector<2xf32> to vector<2x1xf32>
    %180 = vector.broadcast %179 : vector<2x1xf32> to vector<2x8xf32>
    %181 = arith.subf %177, %180 : vector<2x8xf32>
    %182 = math.exp %181 : vector<2x8xf32>
    %cst_68 = arith.constant dense<0.000000e+00> : vector<2xf32>
    %183 = vector.multi_reduction <add>, %182, %cst_68 [1] : vector<2x8xf32> to vector<2xf32>
    %184 = vector.shape_cast %183 : vector<2xf32> to vector<2x1xf32>
    %185 = tpu.reciprocal %184 {approx = true} : vector<2x1xf32> -> vector<2x1xf32>
    %186 = vector.broadcast %185 : vector<2x1xf32> to vector<2x8xf32>
    %187 = arith.mulf %182, %186 : vector<2x8xf32>
    %188 = vector.shape_cast %187 : vector<2x8xf32> to vector<2x8x1xf32>
    %189 = vector.broadcast %188 : vector<2x8x1xf32> to vector<2x8x32xf32>
    %190 = arith.mulf %189, %0 : vector<2x8x32xf32>
    %cst_69 = arith.constant dense<0.000000e+00> : vector<2x32xf32>
    %191 = vector.multi_reduction <add>, %190, %cst_69 [1] : vector<2x8x32xf32> to vector<2x32xf32>
    %192 = vector.extract_strided_slice %34 {offsets = [4, 0], sizes = [2, 32], strides = [1, 1]} : vector<8x32xf32> to vector<2x32xf32>
    %cst_70 = arith.constant dense<0.000000e+00> : vector<2x32xf32>
    %193 = tpu.matmul %191, %9, %cst_70 {dimension_numbers = #tpu.dot_dimension_numbers<[1], [0], [0], [1], [0, 0, 1, 1], [], []>} : vector<2x32xf32>, vector<32x32xf32>, vector<2x32xf32> -> vector<2x32xf32>
    %194 = arith.addf %192, %193 : vector<2x32xf32>
    %195 = vector.extract_strided_slice %40 {offsets = [4, 0], sizes = [2, 32], strides = [1, 1]} : vector<8x32xf32> to vector<2x32xf32>
    %cst_71 = arith.constant dense<0.000000e+00> : vector<2x32xf32>
    %196 = tpu.matmul %191, %11, %cst_71 {dimension_numbers = #tpu.dot_dimension_numbers<[1], [0], [0], [1], [0, 0, 1, 1], [], []>} : vector<2x32xf32>, vector<32x32xf32>, vector<2x32xf32> -> vector<2x32xf32>
    %197 = arith.addf %195, %196 : vector<2x32xf32>
    %198 = vector.extract_strided_slice %46 {offsets = [4, 0], sizes = [2, 32], strides = [1, 1]} : vector<8x32xf32> to vector<2x32xf32>
    %cst_72 = arith.constant dense<0.000000e+00> : vector<2x32xf32>
    %199 = tpu.matmul %191, %13, %cst_72 {dimension_numbers = #tpu.dot_dimension_numbers<[1], [0], [0], [1], [0, 0, 1, 1], [], []>} : vector<2x32xf32>, vector<32x32xf32>, vector<2x32xf32> -> vector<2x32xf32>
    %200 = arith.addf %198, %199 : vector<2x32xf32>
    %cst_73 = arith.constant dense<0.000000e+00> : vector<2x32xf32>
    %201 = tpu.matmul %168, %15, %cst_73 {dimension_numbers = #tpu.dot_dimension_numbers<[1], [0], [0], [1], [0, 0, 1, 1], [], []>} : vector<2x32xf32>, vector<32x32xf32>, vector<2x32xf32> -> vector<2x32xf32>
    %202 = vector.broadcast %22 : vector<1x32xf32> to vector<2x32xf32>
    %203 = arith.addf %201, %202 : vector<2x32xf32>
    %cst_74 = arith.constant dense<0.000000e+00> : vector<2x32xf32>
    %204 = tpu.matmul %168, %17, %cst_74 {dimension_numbers = #tpu.dot_dimension_numbers<[1], [0], [0], [1], [0, 0, 1, 1], [], []>} : vector<2x32xf32>, vector<32x32xf32>, vector<2x32xf32> -> vector<2x32xf32>
    %205 = vector.broadcast %23 : vector<1x32xf32> to vector<2x32xf32>
    %206 = arith.addf %204, %205 : vector<2x32xf32>
    %cst_75 = arith.constant dense<0.000000e+00> : vector<2x32xf32>
    %207 = tpu.matmul %168, %19, %cst_75 {dimension_numbers = #tpu.dot_dimension_numbers<[1], [0], [0], [1], [0, 0, 1, 1], [], []>} : vector<2x32xf32>, vector<32x32xf32>, vector<2x32xf32> -> vector<2x32xf32>
    %208 = vector.broadcast %24 : vector<1x32xf32> to vector<2x32xf32>
    %209 = arith.addf %207, %208 : vector<2x32xf32>
    %210 = arith.addf %194, %203 : vector<2x32xf32>
    %211 = arith.negf %210 : vector<2x32xf32>
    %212 = math.exp %211 : vector<2x32xf32>
    %cst_76 = arith.constant 1.000000e+00 : f32
    %213 = vector.broadcast %cst_76 : f32 to vector<2x32xf32>
    %214 = arith.addf %213, %212 : vector<2x32xf32>
    %215 = arith.divf %213, %214 : vector<2x32xf32>
    %216 = arith.addf %197, %206 : vector<2x32xf32>
    %217 = arith.negf %216 : vector<2x32xf32>
    %218 = math.exp %217 : vector<2x32xf32>
    %cst_77 = arith.constant 1.000000e+00 : f32
    %219 = vector.broadcast %cst_77 : f32 to vector<2x32xf32>
    %220 = arith.addf %219, %218 : vector<2x32xf32>
    %221 = arith.divf %219, %220 : vector<2x32xf32>
    %222 = arith.mulf %215, %209 : vector<2x32xf32>
    %223 = arith.addf %200, %222 : vector<2x32xf32>
    %224 = math.tanh %223 : vector<2x32xf32>
    %cst_78 = arith.constant 1.000000e+00 : f32
    %225 = vector.broadcast %cst_78 : f32 to vector<2x32xf32>
    %226 = arith.subf %225, %221 : vector<2x32xf32>
    %227 = arith.mulf %226, %224 : vector<2x32xf32>
    %228 = arith.mulf %221, %168 : vector<2x32xf32>
    %229 = arith.addf %227, %228 : vector<2x32xf32>
    %cst_79 = arith.constant dense<0.000000e+00> : vector<2x32xf32>
    %230 = tpu.matmul %229, %7, %cst_79 {dimension_numbers = #tpu.dot_dimension_numbers<[1], [0], [0], [1], [0, 0, 1, 1], [], []>} : vector<2x32xf32>, vector<32x32xf32>, vector<2x32xf32> -> vector<2x32xf32>
    %231 = vector.shape_cast %230 : vector<2x32xf32> to vector<2x1x32xf32>
    %232 = vector.broadcast %231 : vector<2x1x32xf32> to vector<2x8x32xf32>
    %233 = arith.addf %28, %232 : vector<2x8x32xf32>
    %234 = math.tanh %233 : vector<2x8x32xf32>
    %235 = vector.shape_cast %21 : vector<1x32xf32> to vector<1x1x32xf32>
    %236 = vector.broadcast %235 : vector<1x1x32xf32> to vector<2x8x32xf32>
    %237 = arith.mulf %234, %236 : vector<2x8x32xf32>
    %cst_80 = arith.constant dense<0.000000e+00> : vector<2x8xf32>
    %238 = vector.multi_reduction <add>, %237, %cst_80 [2] : vector<2x8x32xf32> to vector<2x8xf32>
    %cst_81 = arith.constant dense<0xFF800000> : vector<2xf32>
    %239 = vector.multi_reduction <maximumf>, %238, %cst_81 [1] : vector<2x8xf32> to vector<2xf32>
    %240 = vector.shape_cast %239 : vector<2xf32> to vector<2x1xf32>
    %241 = vector.broadcast %240 : vector<2x1xf32> to vector<2x8xf32>
    %242 = arith.subf %238, %241 : vector<2x8xf32>
    %243 = math.exp %242 : vector<2x8xf32>
    %cst_82 = arith.constant dense<0.000000e+00> : vector<2xf32>
    %244 = vector.multi_reduction <add>, %243, %cst_82 [1] : vector<2x8xf32> to vector<2xf32>
    %245 = vector.shape_cast %244 : vector<2xf32> to vector<2x1xf32>
    %246 = tpu.reciprocal %245 {approx = true} : vector<2x1xf32> -> vector<2x1xf32>
    %247 = vector.broadcast %246 : vector<2x1xf32> to vector<2x8xf32>
    %248 = arith.mulf %243, %247 : vector<2x8xf32>
    %249 = vector.shape_cast %248 : vector<2x8xf32> to vector<2x8x1xf32>
    %250 = vector.broadcast %249 : vector<2x8x1xf32> to vector<2x8x32xf32>
    %251 = arith.mulf %250, %0 : vector<2x8x32xf32>
    %cst_83 = arith.constant dense<0.000000e+00> : vector<2x32xf32>
    %252 = vector.multi_reduction <add>, %251, %cst_83 [1] : vector<2x8x32xf32> to vector<2x32xf32>
    %253 = vector.extract_strided_slice %34 {offsets = [6, 0], sizes = [2, 32], strides = [1, 1]} : vector<8x32xf32> to vector<2x32xf32>
    %cst_84 = arith.constant dense<0.000000e+00> : vector<2x32xf32>
    %254 = tpu.matmul %252, %9, %cst_84 {dimension_numbers = #tpu.dot_dimension_numbers<[1], [0], [0], [1], [0, 0, 1, 1], [], []>} : vector<2x32xf32>, vector<32x32xf32>, vector<2x32xf32> -> vector<2x32xf32>
    %255 = arith.addf %253, %254 : vector<2x32xf32>
    %256 = vector.extract_strided_slice %40 {offsets = [6, 0], sizes = [2, 32], strides = [1, 1]} : vector<8x32xf32> to vector<2x32xf32>
    %cst_85 = arith.constant dense<0.000000e+00> : vector<2x32xf32>
    %257 = tpu.matmul %252, %11, %cst_85 {dimension_numbers = #tpu.dot_dimension_numbers<[1], [0], [0], [1], [0, 0, 1, 1], [], []>} : vector<2x32xf32>, vector<32x32xf32>, vector<2x32xf32> -> vector<2x32xf32>
    %258 = arith.addf %256, %257 : vector<2x32xf32>
    %259 = vector.extract_strided_slice %46 {offsets = [6, 0], sizes = [2, 32], strides = [1, 1]} : vector<8x32xf32> to vector<2x32xf32>
    %cst_86 = arith.constant dense<0.000000e+00> : vector<2x32xf32>
    %260 = tpu.matmul %252, %13, %cst_86 {dimension_numbers = #tpu.dot_dimension_numbers<[1], [0], [0], [1], [0, 0, 1, 1], [], []>} : vector<2x32xf32>, vector<32x32xf32>, vector<2x32xf32> -> vector<2x32xf32>
    %261 = arith.addf %259, %260 : vector<2x32xf32>
    %cst_87 = arith.constant dense<0.000000e+00> : vector<2x32xf32>
    %262 = tpu.matmul %229, %15, %cst_87 {dimension_numbers = #tpu.dot_dimension_numbers<[1], [0], [0], [1], [0, 0, 1, 1], [], []>} : vector<2x32xf32>, vector<32x32xf32>, vector<2x32xf32> -> vector<2x32xf32>
    %263 = vector.broadcast %22 : vector<1x32xf32> to vector<2x32xf32>
    %264 = arith.addf %262, %263 : vector<2x32xf32>
    %cst_88 = arith.constant dense<0.000000e+00> : vector<2x32xf32>
    %265 = tpu.matmul %229, %17, %cst_88 {dimension_numbers = #tpu.dot_dimension_numbers<[1], [0], [0], [1], [0, 0, 1, 1], [], []>} : vector<2x32xf32>, vector<32x32xf32>, vector<2x32xf32> -> vector<2x32xf32>
    %266 = vector.broadcast %23 : vector<1x32xf32> to vector<2x32xf32>
    %267 = arith.addf %265, %266 : vector<2x32xf32>
    %cst_89 = arith.constant dense<0.000000e+00> : vector<2x32xf32>
    %268 = tpu.matmul %229, %19, %cst_89 {dimension_numbers = #tpu.dot_dimension_numbers<[1], [0], [0], [1], [0, 0, 1, 1], [], []>} : vector<2x32xf32>, vector<32x32xf32>, vector<2x32xf32> -> vector<2x32xf32>
    %269 = vector.broadcast %24 : vector<1x32xf32> to vector<2x32xf32>
    %270 = arith.addf %268, %269 : vector<2x32xf32>
    %271 = arith.addf %255, %264 : vector<2x32xf32>
    %272 = arith.negf %271 : vector<2x32xf32>
    %273 = math.exp %272 : vector<2x32xf32>
    %cst_90 = arith.constant 1.000000e+00 : f32
    %274 = vector.broadcast %cst_90 : f32 to vector<2x32xf32>
    %275 = arith.addf %274, %273 : vector<2x32xf32>
    %276 = arith.divf %274, %275 : vector<2x32xf32>
    %277 = arith.addf %258, %267 : vector<2x32xf32>
    %278 = arith.negf %277 : vector<2x32xf32>
    %279 = math.exp %278 : vector<2x32xf32>
    %cst_91 = arith.constant 1.000000e+00 : f32
    %280 = vector.broadcast %cst_91 : f32 to vector<2x32xf32>
    %281 = arith.addf %280, %279 : vector<2x32xf32>
    %282 = arith.divf %280, %281 : vector<2x32xf32>
    %283 = arith.mulf %276, %270 : vector<2x32xf32>
    %284 = arith.addf %261, %283 : vector<2x32xf32>
    %285 = math.tanh %284 : vector<2x32xf32>
    %cst_92 = arith.constant 1.000000e+00 : f32
    %286 = vector.broadcast %cst_92 : f32 to vector<2x32xf32>
    %287 = arith.subf %286, %282 : vector<2x32xf32>
    %288 = arith.mulf %287, %285 : vector<2x32xf32>
    %289 = arith.mulf %282, %229 : vector<2x32xf32>
    %290 = arith.addf %288, %289 : vector<2x32xf32>
    %291 = tpu.concatenate %107, %168, %229, %290 in 0 : vector<2x32xf32>, vector<2x32xf32>, vector<2x32xf32>, vector<2x32xf32> -> vector<8x32xf32>
    %c0_93 = arith.constant 0 : index
    %c0_94 = arith.constant 0 : index
    %292 = vector.load %arg7[%c0_93, %c0_94] : memref<32x128xf32, #tpu.memory_space<vmem>>, vector<32x128xf32>
    %cst_95 = arith.constant dense<0.000000e+00> : vector<8x128xf32>
    %293 = tpu.matmul %291, %292, %cst_95 {dimension_numbers = #tpu.dot_dimension_numbers<[1], [0], [0], [1], [0, 0, 1, 1], [], []>} : vector<8x32xf32>, vector<32x128xf32>, vector<8x128xf32> -> vector<8x128xf32>
    %c0_96 = arith.constant 0 : index
    %c0_97 = arith.constant 0 : index
    %294 = vector.load %arg8[%c0_96, %c0_97] : memref<1x128xf32, #tpu.memory_space<vmem>>, vector<1x128xf32>
    %295 = vector.broadcast %294 : vector<1x128xf32> to vector<8x128xf32>
    %296 = arith.addf %293, %295 : vector<8x128xf32>
    %cst_98 = arith.constant dense<0xFF800000> : vector<8xf32>
    %297 = vector.multi_reduction <maximumf>, %296, %cst_98 [1] : vector<8x128xf32> to vector<8xf32>
    %298 = vector.shape_cast %297 : vector<8xf32> to vector<8x1xf32>
    %299 = vector.broadcast %298 : vector<8x1xf32> to vector<8x128xf32>
    %300 = arith.subf %296, %299 : vector<8x128xf32>
    %301 = math.exp %300 : vector<8x128xf32>
    %cst_99 = arith.constant dense<0.000000e+00> : vector<8xf32>
    %302 = vector.multi_reduction <add>, %301, %cst_99 [1] : vector<8x128xf32> to vector<8xf32>
    %303 = vector.shape_cast %302 : vector<8xf32> to vector<8x1xf32>
    %304 = math.log %303 : vector<8x1xf32>
    %305 = arith.addf %304, %298 : vector<8x1xf32>
    %306 = vector.broadcast %305 : vector<8x1xf32> to vector<8x128xf32>
    %307 = arith.subf %296, %306 : vector<8x128xf32>
    %c0_100 = arith.constant 0 : index
    %c0_101 = arith.constant 0 : index
    %308 = vector.load %arg9[%c0_100, %c0_101] : memref<8x128xf32, #tpu.memory_space<vmem>>, vector<8x128xf32>
    tpu.vector_store %arg9[%c0_100, %c0_101], %307 {strides = array<i32>} : memref<8x128xf32, #tpu.memory_space<vmem>>, vector<8x128xf32>,
    return
  }
  func.func @transform_0(%arg0: i32) -> (i32, i32) {
    %c0_i32 = arith.constant 0 : i32
    %c0_i32_0 = arith.constant 0 : i32
    %c0_i32_1 = arith.constant 0 : i32
    return %c0_i32, %c0_i32_0 : i32, i32
  }
  func.func @transform_1(%arg0: i32) -> (i32, i32, i32) {
    %c0_i32 = arith.constant 0 : i32
    %c0_i32_0 = arith.constant 0 : i32
    %c0_i32_1 = arith.constant 0 : i32
    %c0_i32_2 = arith.constant 0 : i32
    return %c0_i32, %c0_i32_0, %c0_i32_1 : i32, i32, i32
  }
  func.func @transform_2(%arg0: i32) -> (i32, i32) {
    %c0_i32 = arith.constant 0 : i32
    %c0_i32_0 = arith.constant 0 : i32
    %c0_i32_1 = arith.constant 0 : i32
    return %c0_i32, %c0_i32_0 : i32, i32
  }
  func.func @transform_3(%arg0: i32) -> (i32, i32, i32) {
    %c0_i32 = arith.constant 0 : i32
    %c0_i32_0 = arith.constant 0 : i32
    %c0_i32_1 = arith.constant 0 : i32
    %c0_i32_2 = arith.constant 0 : i32
    return %c0_i32, %c0_i32_0, %c0_i32_1 : i32, i32, i32
  }
  func.func @transform_4(%arg0: i32) -> (i32, i32, i32) {
    %c0_i32 = arith.constant 0 : i32
    %c0_i32_0 = arith.constant 0 : i32
    %c0_i32_1 = arith.constant 0 : i32
    %c0_i32_2 = arith.constant 0 : i32
    return %c0_i32, %c0_i32_0, %c0_i32_1 : i32, i32, i32
  }
  func.func @transform_5(%arg0: i32) -> (i32, i32) {
    %c0_i32 = arith.constant 0 : i32
    %c0_i32_0 = arith.constant 0 : i32
    %c0_i32_1 = arith.constant 0 : i32
    return %c0_i32, %c0_i32_0 : i32, i32
  }
  func.func @transform_6(%arg0: i32) -> (i32, i32) {
    %c0_i32 = arith.constant 0 : i32
    %c0_i32_0 = arith.constant 0 : i32
    %c0_i32_1 = arith.constant 0 : i32
    return %c0_i32, %c0_i32_0 : i32, i32
  }
  func.func @transform_7(%arg0: i32) -> (i32, i32) {
    %c0_i32 = arith.constant 0 : i32
    %c0_i32_0 = arith.constant 0 : i32
    %c0_i32_1 = arith.constant 0 : i32
    return %c0_i32, %c0_i32_0 : i32, i32
  }
  func.func @transform_8(%arg0: i32) -> (i32, i32) {
    %c0_i32 = arith.constant 0 : i32
    %c0_i32_0 = arith.constant 0 : i32
    %c0_i32_1 = arith.constant 0 : i32
    return %c0_i32, %c0_i32_0 : i32, i32
  }
}

</mosaic_0001>

<bundles_post_ra>
// kernel: tpu_custom_call.1
= control target key start
LH: loop header
LB: loop body
LE: loop exit
PB: predicated region body
PF: predicated region fallthrough
CT: control target
= control target key end

     0   :  { %13 = vsyncpa [#allocation3], 0  ;;  %s4851_s0 = inlined_call_operand.hbm [shape: f32[8,16], index: 0, kind: input, shape index: {}]   ;;  %s4852_s1 = inlined_call_operand.hbm [shape: f32[2,8,32], index: 1, kind: input, shape index: {}]   ;;  %s4853_s2 = inlined_call_operand.hbm [shape: f32[2,32], index: 2, kind: input, shape index: {}]   ;;  %s4854_s3 = inlined_call_operand.hbm [shape: f32[8,32,32], index: 3, kind: input, shape index: {}]   ;;  %s4855_s4 = inlined_call_operand.hbm [shape: f32[3,16,32], index: 4, kind: input, shape index: {}]   ;;  %s4856_s5 = inlined_call_operand.vmem [shape: f32[8,32], index: 5, kind: input, shape index: {}]   ;;  %s4857_s6 = inlined_call_operand.hbm [shape: f32[32,128], index: 6, kind: input, shape index: {}]   ;;  %s4858_s7 = inlined_call_operand.vmem [shape: f32[1,128], index: 7, kind: input, shape index: {}]   ;;  %s4859_s8 = inlined_call_operand.hbm [shape: f32[8,128], index: 8, kind: output, shape index: {}]  }
   0x1   :  { %14 = vsyncpa [#allocation6], 0 }
   0x2   :  { %15 = vsyncpa [#allocation9], 0 }
   0x3   :  { %16 = vsyncpa [#allocation12], 0 }
   0x4   :  { %17 = vsyncpa [#allocation4], 0  ;;  %s4143_s27 = smov [#allocation5]  }
   0x5   :  { %s33_s28 = sshll.u32 %s4143_s27, 4  ;;  %s34_s28 = int_to_ptr.vmem [resolvable:$true] %s33_s28 }
   0x6   :  { %s4001_s29 = scalar_lea.vmem %s34_s28, 256  ;;  %p4006_p1 = scmp.lt.s32.totalorder %s34_s28, %s34_s28 }
   0x7   :  { %p4002_p0 = scmp.ne.s32.totalorder %s34_s28, %s4001_s29  ;;  %p4007_p2 = scmp.lt.s32.totalorder %s4001_s29, %s4001_s29 }
   0x9   :  { %p4008_p3 = por %p4007_p2, %p4006_p1 }
   0xb   :  { %p4009_p4 = pnand %p4008_p3, %p4002_p0 }
   0xd   :  { %4012 = shalt.err (!%p4009_p4)
}
   0xe   :  { %s4144_s30 = smov 128   ;;  %s4145_s9 = smov 8  }
   0xf   :  { %39 = dma.hbm_to_vmem [thread:$0]  %s4852_s1, 256, %s34_s28, [#allocation6], %s4144_s30, %s4144_s30, %s4145_s9  }
  0x10   :  { %s4146_s12 = smov [#allocation8]   ;;  %s4147_s14 = smov [#allocation2]  }
  0x11   :  { %s55_s13 = sshll.u32 %s4146_s12, 4  ;;  %s24_s15 = sshll.u32 %s4147_s14, 4  ;;  %s56_s13 = int_to_ptr.vmem [resolvable:$true] %s55_s13  ;;  %s25_s15 = int_to_ptr.vmem [resolvable:$true] %s24_s15 }
  0x12   :  { %s4021_s16 = scalar_lea.vmem %s56_s13, 4096  ;;  %p4026_p6 = scmp.lt.s32.totalorder %s56_s13, %s56_s13 }
  0x13   :  { %p4022_p5 = scmp.ne.s32.totalorder %s56_s13, %s4021_s16  ;;  %p4027_p7 = scmp.lt.s32.totalorder %s4021_s16, %s4021_s16 }
  0x15   :  { %p4028_p8 = por %p4027_p7, %p4026_p6 }
  0x17   :  { %p4029_p9 = pnand %p4028_p8, %p4022_p5 }
  0x19   :  { %4032 = shalt.err (!%p4029_p9)
}
  0x1a   :  { %61 = dma.hbm_to_vmem [thread:$0]  %s4854_s3, 4096, %s56_s13, [#allocation9], %s4144_s30, %s4144_s30, %s4145_s9  }
  0x1b   :  { %s4041_s1 = scalar_lea.vmem %s25_s15, 128  ;;  %p4046_p11 = scmp.lt.s32.totalorder %s25_s15, %s25_s15 }
  0x1c   :  { %p4042_p10 = scmp.ne.s32.totalorder %s25_s15, %s4041_s1  ;;  %p4047_p12 = scmp.lt.s32.totalorder %s4041_s1, %s4041_s1 }
  0x1e   :  { %p4048_p13 = por %p4047_p12, %p4046_p11 }
  0x20   :  { %p4049_p0 = pnand %p4048_p13, %p4042_p10 }
  0x22   :  { %4052 = shalt.err (!%p4049_p0)
}
  0x23   :  { %27 = dma.hbm_to_vmem [thread:$0]  %s4851_s0, 128, %s25_s15, [#allocation3]  }
  0x24   :  { %s4148_s21 = smov [#allocation7]   ;;  %s4149_s23 = smov [#allocation10]  }
  0x25   :  { %s46_s22 = sshll.u32 %s4148_s21, 4  ;;  %s67_s24 = sshll.u32 %s4149_s23, 4  ;;  %s47_s22 = int_to_ptr.vmem [resolvable:$true] %s46_s22  ;;  %s68_s24 = int_to_ptr.vmem [resolvable:$true] %s67_s24 }
  0x26   :  { %s4061_s25 = scalar_lea.vmem %s47_s22, 32  ;;  %p4066_p2 = scmp.lt.s32.totalorder %s47_s22, %s47_s22 }
  0x27   :  { %p4062_p1 = scmp.ne.s32.totalorder %s47_s22, %s4061_s25  ;;  %p4067_p3 = scmp.lt.s32.totalorder %s4061_s25, %s4061_s25 }
  0x29   :  { %p4068_p4 = por %p4067_p3, %p4066_p2 }
  0x2b   :  { %p4069_p5 = pnand %p4068_p4, %p4062_p1 }
  0x2d   :  { %4072 = shalt.err (!%p4069_p5)
}
  0x2e   :  { %49 = dma.hbm_to_vmem [thread:$0]  %s4853_s2, 32, %s47_s22, [#allocation6]  }
  0x2f   :  { %s4081_s27 = scalar_lea.vmem %s68_s24, 768  ;;  %p4086_p7 = scmp.lt.s32.totalorder %s68_s24, %s68_s24 }
  0x30   :  { %p4082_p6 = scmp.ne.s32.totalorder %s68_s24, %s4081_s27  ;;  %p4087_p8 = scmp.lt.s32.totalorder %s4081_s27, %s4081_s27 }
  0x32   :  { %p4088_p9 = por %p4087_p8, %p4086_p7 }
  0x34   :  { %p4089_p10 = pnand %p4088_p9, %p4082_p6 }
  0x36   :  { %4092 = shalt.err (!%p4089_p10)
}
  0x37   :  { %73 = dma.hbm_to_vmem [thread:$0]  %s4855_s4, 768, %s68_s24, [#allocation9], %s4144_s30, %s4144_s30, %s4145_s9  }
  0x38   :  { %s4150_s29 = smov [#allocation11]  }
  0x39   :  { %s81_s10 = sshll.u32 %s4150_s29, 4  ;;  %s82_s10 = int_to_ptr.vmem [resolvable:$true] %s81_s10 }
  0x3a   :  { %s4101_s11 = scalar_lea.vmem %s82_s10, 512  ;;  %p4106_p12 = scmp.lt.s32.totalorder %s82_s10, %s82_s10 }
  0x3b   :  { %p4102_p11 = scmp.ne.s32.totalorder %s82_s10, %s4101_s11  ;;  %p4107_p13 = scmp.lt.s32.totalorder %s4101_s11, %s4101_s11 }
  0x3d   :  { %p4108_p0 = por %p4107_p13, %p4106_p12 }
  0x3f   :  { %p4109_p1 = pnand %p4108_p0, %p4102_p11 }
  0x41   :  { %4112 = shalt.err (!%p4109_p1)
}
  0x42   :  { %87 = dma.hbm_to_vmem [thread:$0]  %s4857_s6, 512, %s82_s10, [#allocation12], %s4144_s30, %s4144_s30, %s4145_s9  }
  0x43   :  { %4133 = dma.done.wait [#allocation3], 128  }
  0x44   :  { %4134 = vsyncadd [#allocation3], 4294967168 }
  0x45   :  { %4135 = dma.done.wait [#allocation6], 288  }
  0x46   :  { %4136 = vsyncadd [#allocation6], 4294967008 }
  0x47   :  { %4137 = dma.done.wait [#allocation9], 4864  }
  0x48   :  { %4138 = vsyncadd [#allocation9], 4294962432 }
  0x49   :  { %4139 = dma.done.wait [#allocation12], 512  }
  0x4a   :  { %4140 = vsyncadd [#allocation12], 4294966784  ;;  %v4151_v0 = vmov 0.0   ;;  %vm4152_vm0 = vmmov 0   ;;  %v239_v1 = vld [vmem:[#allocation10 + $0x8] sm:$0xff]  ;;  %v238_v2 = vld [vmem:[#allocation10] sm:$0xff]  ;;  %v152_v21 = vlaneseq }
  0x4b   :  { %3528 = vmatprep.subr.mxu1 %v4151_v0  ;;  %3532 = vmatprep.mubr.msk.f32.mxu1 %vm4152_vm0, %v4151_v0  ;;  %v4234_v3 = vld [vmem:[#allocation2] sm:$0xff]  ;;  %vm244_vm1 = vcmask 130048   ;;  %v116_v4 = vld [vmem:[#allocation8 + $0x18] sm:$0xff]  ;;  %v115_v6 = vld [vmem:[#allocation8 + $0x10] sm:$0xff]  ;;  %vm156_vm2 = vcmask 261120   ;;  %vm606_vm3 = vcmask 1041409  }
  0x4c   :  { %3529 = vmatpush3.msra.mxu1 %v239_v1  ;;  %v320_v5 = vld [vmem:[#allocation10 + $0x18] sm:$0xff]  ;;  %3517 = vmatprep.subr.mxu0 %v116_v4  ;;  %v319_v7 = vld [vmem:[#allocation10 + $0x10] sm:$0xff]  ;;  %v114_v9 = vld [vmem:[#allocation8 + $0x8] sm:$0xff]  ;;  %v4153_v18 = vmov 1966171168   ;;  %v4285_v25 = vshrl.u32 %v152_v21, 7 }
  0x4d   :  { %3530 = vmatprep.subr.mxu1 %v4151_v0  ;;  %3518 = vmatpush3.msra.mxu0 %v116_v4  ;;  %v4243_v8 = vld [vmem:[#allocation8 + $0x38] sm:$0xff]  ;;  %v4248_v10 = vld [vmem:[#allocation8 + $0x30] sm:$0xff]  ;;  %v113_v11 = vld [vmem:[#allocation8] sm:$0xff]  ;;  %v547_v19 = vunpack.c.l.s4 %v4153_v18  ;;  %v597_v52 = vand.u32 127, %v152_v21  ;;  %vm609_vm4 = vcmask 58368   ;;  %v4154_v60 = vmov 0  }
  0x4e   :  { %3531 = vmatpush3.msra.mxu1 %v238_v2  ;;  %3519 = vmatprep.subr.mxu0 %v115_v6  ;;  %v4252_v12 = vld [vmem:[#allocation8 + $0x28] sm:$0xff]  ;;  %v4258_v14 = vld [vmem:[#allocation8 + $0x20] sm:$0xff]  ;;  %v4260_v15 = vld [vmem:[#allocation5 + $0x8] sm:$0xff]  ;;  %v4288_v26 = vsub.s32 0, %v4285_v25  ;;  %v4312_v44 = vsub.s32 1, %v4285_v25  ;;  %vm3194_vm5 = vcmask 1041408  }
  0x4f   :  { %3533 = vmatmul.mubr.msk.f32.vlgmr.msra.gmra.mxu1 %vm244_vm1, %v4234_v3  ;;  %3535 = vmatprep.subr.mxu1 %v4151_v0  ;;  %v4254_v13 = vld [vmem:[#allocation5] sm:$0xff]  ;;  %v4265_v16 = vld [vmem:[#allocation7] sm:$0x3]  ;;  %v548_v23 = vunpack.c.0.s8 %v547_v19  ;;  %v4296_v29 = vld [vmem:[%s4856_s5] sm:$0xff]  ;;  %v4323_v54 = vsub.s32 %v597_v52, %v4285_v25  ;;  %vm3196_vm6 = vcmask 1043456   ;;  %vm3198_vm7 = vcmask 1045504  }
  0x50   :  { %3536 = vmatpush3.msra.mxu1 %v320_v5  ;;  %3539 = vmatprep.mubr.msk.f32.mxu1 %vm4152_vm0, %v4151_v0  ;;  %v155_v31 = vrot.slane %v4296_v29, %v4288_v26  ;;  %v4316_v45 = vrot.slane %v4296_v29, %v4312_v44  ;;  %s4155_s9 = smov [#allocation13]  }
  0x51   :  { %3537 = vmatprep.subr.mxu1 %v4151_v0  ;;  %3520 = vmatpush3.msra.mxu0 %v115_v6  ;;  %v4291_v27 = vsub.s32 %v548_v23, %v4285_v25  ;;  %s3302_s13 = sshll.u32 %s4155_s9, 4  ;;  %s3303_s13 = int_to_ptr.vmem [resolvable:$true] %s3302_s13 }
  0x52   :  { %3538 = vmatpush3.msra.mxu1 %v319_v7  ;;  %3521 = vmatprep.subr.mxu0 %v114_v9  ;;  %p4118_p3 = scmp.lt.s32.totalorder %s3303_s13, %s3303_s13 }
  0x53   :  { %3540 = vmatmul.mubr.msk.f32.vlgmr.msra.gmra.mxu1 %vm244_vm1, %v4234_v3  ;;  %3549 = vmatprep.subr.mxu1 %v4151_v0 }
  0x54   :  { %3550 = vmatpush3.msra.mxu1 %v4243_v8  ;;  %3522 = vmatpush3.msra.mxu0 %v114_v9 }
  0x55   :  { %3551 = vmatprep.subr.mxu1 %v4151_v0  ;;  %3523 = vmatprep.subr.mxu0 %v113_v11 }
  0x56   :  { %3552 = vmatpush3.msra.mxu1 %v4248_v10  ;;  %3524 = vmatpush3.msra.mxu0 %v113_v11 }
  0x57   :  { %3553 = vmatprep.subr.mxu1 %v4151_v0  ;;  %3525 = vmatprep.mubr.msk.f32.mxu0 %vm156_vm2, %v4254_v13 }
  0x58   :  { %3554 = vmatpush3.msra.mxu1 %v4252_v12  ;;  %3557 = vmatprep.mubr.msk.f32.mxu1 %vm4152_vm0, %v4151_v0 }
  0x59   :  { %3555 = vmatprep.subr.mxu1 %v4151_v0  ;;  %3526 = vmatmul.mubr.msk.f32.vlgmr.msra.gmra.mxu0 %vm156_vm2, %v4260_v15 }
  0x5a   :  { %3556 = vmatpush3.msra.mxu1 %v4258_v14  ;;  %3542 = vmatprep.subr.mxu0 %v4151_v0 }
  0x5b   :  { %3558 = vmatmul.mubr.msk.f32.vlgmr.msra.gmra.mxu1 %vm156_vm2, %v4265_v16  ;;  %3546 = vmatprep.mubr.msk.f32.mxu0 %vm4152_vm0, %v4151_v0 }
  0x5c   :  { %3571 = vmatprep.subr.mxu1 %v4151_v0  ;;  %3579 = vmatprep.mubr.msk.f32.mxu1 %vm4152_vm0, %v4151_v0 }
  0x5d   :  { %3882 = vset.pattern.permute.xlu0 %v4154_v60  ;;  %3881 = vset.pattern.permute.xlu1 %v4154_v60 }
 0x10f   :  { %v4281_v17 = vpop.f32.mrf.mxu1 }
 0x111   :  { %v3534_v20 = vpop.f32.mrf.mxu1 }
 0x113   :  { %v4283_v22 = vpop.f32.mrf.mxu1 }
 0x115   :  { %v3541_v24 = vpop.f32.mrf.mxu1 }
 0x119   :  { %v3527_v28 = vpop.f32.mrf.mxu0 }
 0x11a   :  { %v4306_v40 = vadd.f32 %v3527_v28, %v155_v31 }
 0x11b   :  { %v541_v30 = vpop.f32.mrf.mxu1  ;;  %v229_v33 = vpop.f32.mrf.mxu0 }
 0x11c   :  { %v552_v32 = vrot.slane %v541_v30, %v4291_v27  ;;  %v4304_v39 = vadd.f32 %v229_v33, %v155_v31  ;;  %v397_v33 = vld [vmem:[#allocation10 + $0x28] sm:$0xff] }
 0x11d   :  { %v3559_v34 = vpop.f32.mrf.mxu1  ;;  %3543 = vmatpush3.msra.mxu0 %v397_v33 }
 0x11e   :  { %v553_v35 = vcombine.high %v552_v32, %v552_v32  ;;  %v560_v36 = vrot.slane %v552_v32, %v4291_v27  ;;  %3544 = vmatprep.subr.mxu0 %v4151_v0  ;;  %v396_v34 = vld [vmem:[#allocation10 + $0x20] sm:$0xff] }
 0x11f   :  { %3545 = vmatpush3.msra.mxu0 %v396_v34 }
 0x120   :  { %v567_v37 = vrot.slane %v553_v35, %v4291_v27  ;;  %v571_v38 = vrot.slane %v560_v36, %v4288_v26  ;;  %3560 = vmatprep.subr.mxu0 %v4151_v0  ;;  %3547 = vmatmul.mubr.msk.f32.vlgmr.msra.gmra.mxu0 %vm244_vm1, %v4234_v3  ;;  %v4341_v35 = vld [vmem:[#allocation8 + $0x58] sm:$0xff]  ;;  %v4357_v3 = vld [vmem:[#allocation8 + $0x48] sm:$0xff] }
 0x121   :  { %v4343_v36 = vld [vmem:[#allocation8 + $0x78] sm:$0xff]  ;;  %3561 = vmatpush3.msra.mxu0 %v4341_v35  ;;  %3568 = vmatprep.mubr.msk.f32.mxu0 %vm4152_vm0, %v4151_v0 }
 0x122   :  { %v575_v41 = vrot.slane %v567_v37, %v4288_v26  ;;  %v578_v42 = vadd.f32 %v571_v38, %v4304_v39  ;;  %3572 = vmatpush3.msra.mxu1 %v4343_v36  ;;  %3562 = vmatprep.subr.mxu0 %v4151_v0  ;;  %v4349_v37 = vld [vmem:[#allocation8 + $0x50] sm:$0xff] }
 0x123   :  { %3573 = vmatprep.subr.mxu1 %v4151_v0  ;;  %v4351_v38 = vld [vmem:[#allocation8 + $0x70] sm:$0xff]  ;;  %3563 = vmatpush3.msra.mxu0 %v4349_v37 }
 0x124   :  { %v579_v43 = vadd.f32 %v575_v41, %v4306_v40  ;;  %3883 = vtanh.f32 %v578_v42  ;;  %3574 = vmatpush3.msra.mxu1 %v4351_v38  ;;  %3564 = vmatprep.subr.mxu0 %v4151_v0  ;;  %v4359_v41 = vld [vmem:[#allocation8 + $0x68] sm:$0xff]  ;;  %v4365_v42 = vld [vmem:[#allocation8 + $0x40] sm:$0xff] }
 0x125   :  { %3575 = vmatprep.subr.mxu1 %v4151_v0  ;;  %3565 = vmatpush3.msra.mxu0 %v4357_v3 }
 0x126   :  { %3885 = vtanh.f32 %v579_v43  ;;  %3576 = vmatpush3.msra.mxu1 %v4359_v41  ;;  %3566 = vmatprep.subr.mxu0 %v4151_v0  ;;  %v4367_v43 = vld [vmem:[#allocation8 + $0x60] sm:$0xff] }
 0x127   :  { %3577 = vmatprep.subr.mxu1 %v4151_v0  ;;  %3567 = vmatpush3.msra.mxu0 %v4365_v42 }
 0x128   :  { %3578 = vmatpush3.msra.mxu1 %v4367_v43  ;;  %3582 = vmatprep.subr.mxu0 %v4151_v0 }
 0x129   :  { %3593 = vmatprep.subr.mxu1 %v4151_v0 }
 0x131   :  { %v3884_v46 = vpop.eup %3883 }
 0x132   :  { %v586_v47 = vmul.f32 %v3884_v46, %v4316_v45 }
 0x133   :  { %v3886_v48 = vpop.eup %3885 }
 0x134   :  { %v588_v49 = vsel %vm156_vm2, %v586_v47, 0.0  ;;  %v587_v50 = vmul.f32 %v3886_v48, %v4316_v45 }
 0x135   :  { %589 = vadd.xlane.f32.xlu0 %v588_v49 }
 0x136   :  { %v591_v51 = vsel %vm156_vm2, %v587_v50, 0.0 }
 0x139   :  { %592 = vadd.xlane.f32.xlu0 %v591_v51 }
 0x1be   :  { %v590_v53 = vpop.xlane.xlu0 %589 }
 0x1bf   :  { %v601_v56 = vrot.slane %v590_v53, %v4323_v54 }
 0x1c2   :  { %v593_v55 = vpop.xlane.xlu0 %592 }
 0x1c3   :  { %v605_v57 = vrot.slane %v593_v55, %v4323_v54 }
 0x1c5   :  { %v607_v58 = vsel %vm606_vm3, %v605_v57, %v601_v56 }
 0x1c6   :  { %v610_v59 = vsel %vm609_vm4, %v607_v58, -inf }
 0x1c7   :  { %611 = vmax.xlane.f32.xlu1 %v610_v59 }
 0x1e0   :  { %v468_v33 = vpop.f32.mrf.mxu0 }
 0x1e2   :  { %v3548_v34 = vpop.f32.mrf.mxu0 }
 0x250   :  { %v612_v61 = vpop.xlane.xlu1 %611 }
 0x251   :  { %v617_v62 = vrot.slane %v612_v61, %v4288_v26  ;;  %v621_v63 = vrot.slane %v612_v61, %v4312_v44 }
 0x253   :  { %v624_v1 = vsub.f32 %v590_v53, %v617_v62  ;;  %v625_v2 = vsub.f32 %v593_v55, %v621_v63 }
 0x255   :  { %v626_v4 = vmul.f32 1.442695, %v624_v1  ;;  %v628_v5 = vmul.f32 1.442695, %v625_v2  ;;  %v4379_v2 = vld [vmem:[#allocation8 + $0x98] sm:$0xff] }
 0x257   :  { %3887 = vpow2.f32 %v626_v4  ;;  %v4381_v4 = vld [vmem:[#allocation8 + $0xb8] sm:$0xff] }
 0x258   :  { %3889 = vpow2.f32 %v628_v5 }
 0x264   :  { %v3888_v6 = vpop.eup %3887 }
 0x265   :  { %v3890_v7 = vpop.eup %3889  ;;  %633 = vperm.xlu1 %3881, %v3888_v6  }
 0x266   :  { %636 = vperm.xlu0 %3882, %v3890_v7  }
 0x2e0   :  { %v634_v9 = vpop.permute.xlu1 %633 }
 0x2e1   :  { %v637_v11 = vpop.permute.xlu0 %636  ;;  %v641_v18 = vrot.slane %v634_v9, %v4323_v54  ;;  %v4394_v9 = vld [vmem:[#allocation8 + $0x88] sm:$0xff] }
 0x2e2   :  { %v645_v19 = vrot.slane %v637_v11, %v4323_v54  ;;  %v4396_v11 = vld [vmem:[#allocation8 + $0xa8] sm:$0xff] }
 0x2e4   :  { %v646_v20 = vsel %vm606_vm3, %v645_v19, %v641_v18  ;;  %v4402_v18 = vld [vmem:[#allocation8 + $0x80] sm:$0xff] }
 0x2e5   :  { %v648_v21 = vsel %vm609_vm4, %v646_v20, 0.0  ;;  %v4406_v19 = vld [vmem:[#allocation8 + $0xa0] sm:$0xff]  ;;  %v4416_v20 = vld [vmem:[#allocation8 + $0xd8] sm:$0xff] }
 0x2e6   :  { %649 = vadd.xlane.f32.xlu1 %v648_v21  ;;  %v4421_v21 = vld [vmem:[#allocation8 + $0xf8] sm:$0xff] }
 0x36f   :  { %v650_v23 = vpop.xlane.xlu1 %649 }
 0x370   :  { %3891 = vrcp.f32 %v650_v23  ;;  %v4424_v23 = vld [vmem:[#allocation8 + $0xd0] sm:$0xff] }
 0x37d   :  { %v3892_v24 = vpop.eup %3891 }
 0x37e   :  { %v656_v28 = vrot.slane %v3892_v24, %v4288_v26  ;;  %v660_v31 = vrot.slane %v3892_v24, %v4312_v44  ;;  %v4430_v24 = vld [vmem:[#allocation8 + $0xf0] sm:$0xff] }
 0x380   :  { %v663_v30 = vmul.f32 %v3888_v6, %v656_v28  ;;  %v664_v32 = vmul.f32 %v3890_v7, %v660_v31  ;;  %v4386_v6 = vld [vmem:[#allocation8 + $0x90] sm:$0xff]  ;;  %v4433_v28 = vld [vmem:[#allocation8 + $0xc8] sm:$0xff]  ;;  %v4441_v31 = vld [vmem:[#allocation8 + $0xc0] sm:$0xff] }
 0x381   :  { %v4388_v7 = vld [vmem:[#allocation8 + $0xb0] sm:$0xff] }
 0x382   :  { %667 = vperm.xlu0 %3882, %v663_v30   ;;  %v4438_v30 = vld [vmem:[#allocation8 + $0xe8] sm:$0xff] }
 0x386   :  { %672 = vperm.xlu0 %3882, %v664_v32   ;;  %v4446_v32 = vld [vmem:[#allocation8 + $0xe0] sm:$0xff] }
 0x3fd   :  { %v668_v46 = vpop.permute.xlu0 %667 }
 0x3fe   :  { %v675_v47 = vmul.f32 %v668_v46, %v4254_v13  ;;  %v242_v46 = vsub.s32 2, %v4285_v25 }
 0x400   :  { %v677_v48 = vsel %vm156_vm2, %v675_v47, 0.0 }
 0x401   :  { %v678_v49 = vrot.slane %v677_v48, 4  ;;  %v673_v50 = vpop.permute.xlu0 %672 }
 0x402   :  { %v676_v51 = vmul.f32 %v673_v50, %v4260_v15 }
 0x403   :  { %v679_v52 = vadd.f32 %v678_v49, %v677_v48 }
 0x404   :  { %v684_v53 = vsel %vm156_vm2, %v676_v51, 0.0  ;;  %v911_v51 = vsub.s32 5, %v4285_v25 }
 0x405   :  { %v680_v55 = vrot.slane %v679_v52, 2  ;;  %v685_v56 = vrot.slane %v684_v53, 4 }
 0x407   :  { %v681_v57 = vadd.f32 %v680_v55, %v679_v52  ;;  %v686_v58 = vadd.f32 %v685_v56, %v684_v53  ;;  %v243_v52 = vrot.slane %v4296_v29, %v242_v46  ;;  %v4485_v53 = vrot.slane %v4296_v29, %v911_v51 }
 0x408   :  { %v323_v56 = vsub.s32 3, %v4285_v25 }
 0x409   :  { %v687_v59 = vrot.slane %v686_v58, 2  ;;  %v682_v60 = vrot.slane %v681_v57, 1  ;;  %v4488_v55 = vadd.f32 %v4281_v17, %v243_v52 }
 0x40b   :  { %v688_v61 = vadd.f32 %v687_v59, %v686_v58  ;;  %v683_v63 = vadd.f32 %v682_v60, %v681_v57 }
 0x40d   :  { %v689_v62 = vrot.slane %v688_v61, 1 }
 0x40f   :  { %v690_v1 = vadd.f32 %v689_v62, %v688_v61 }
 0x411   :  { %v693_v5 = vsel %vm606_vm3, %v690_v1, %v683_v63  ;;  %v985_v63 = vsub.s32 6, %v4285_v25 }
 0x412   :  { %3569 = vmatmul.mubr.msk.f32.vlgmr.msra.gmra.mxu0 %vm156_vm2, %v693_v5  ;;  %3580 = vmatmul.mubr.msk.f32.vlgmr.msra.gmra.mxu1 %vm156_vm2, %v693_v5 }
 0x413   :  { %3583 = vmatpush3.msra.mxu0 %v4379_v2  ;;  %3594 = vmatpush3.msra.mxu1 %v4381_v4  ;;  %v4496_v46 = vrot.slane %v4296_v29, %v985_v63  ;;  %v400_v63 = vsub.s32 4, %v4285_v25 }
 0x414   :  { %3584 = vmatprep.subr.mxu0 %v4151_v0  ;;  %3595 = vmatprep.subr.mxu1 %v4151_v0 }
 0x415   :  { %3585 = vmatpush3.msra.mxu0 %v4386_v6  ;;  %3596 = vmatpush3.msra.mxu1 %v4388_v7 }
 0x416   :  { %3586 = vmatprep.subr.mxu0 %v4151_v0  ;;  %3597 = vmatprep.subr.mxu1 %v4151_v0 }
 0x417   :  { %3587 = vmatpush3.msra.mxu0 %v4394_v9  ;;  %3598 = vmatpush3.msra.mxu1 %v4396_v11 }
 0x418   :  { %3588 = vmatprep.subr.mxu0 %v4151_v0  ;;  %3599 = vmatprep.subr.mxu1 %v4151_v0 }
 0x419   :  { %3589 = vmatpush3.msra.mxu0 %v4402_v18  ;;  %3590 = vmatprep.mubr.msk.f32.mxu0 %vm4152_vm0, %v4151_v0 }
 0x41a   :  { %3600 = vmatpush3.msra.mxu1 %v4406_v19  ;;  %3601 = vmatprep.mubr.msk.f32.mxu1 %vm4152_vm0, %v4151_v0 }
 0x41b   :  { %3591 = vmatmul.mubr.msk.f32.vlgmr.msra.gmra.mxu0 %vm156_vm2, %v693_v5  ;;  %3602 = vmatmul.mubr.msk.f32.vlgmr.msra.gmra.mxu1 %vm156_vm2, %v4265_v16  ;;  %v324_v5 = vrot.slane %v4296_v29, %v323_v56 }
 0x41c   :  { %3604 = vmatprep.subr.mxu0 %v4151_v0  ;;  %3612 = vmatprep.mubr.msk.f32.mxu0 %vm4152_vm0, %v4151_v0 }
 0x41d   :  { %3605 = vmatpush3.msra.mxu0 %v4416_v20  ;;  %3615 = vmatprep.subr.mxu1 %v4151_v0  ;;  %v4499_v17 = vadd.f32 %v4283_v22, %v324_v5 }
 0x41e   :  { %3606 = vmatprep.subr.mxu0 %v4151_v0  ;;  %3616 = vmatpush3.msra.mxu1 %v4421_v21 }
 0x41f   :  { %3607 = vmatpush3.msra.mxu0 %v4424_v23  ;;  %3617 = vmatprep.subr.mxu1 %v4151_v0 }
 0x420   :  { %3608 = vmatprep.subr.mxu0 %v4151_v0  ;;  %3618 = vmatpush3.msra.mxu1 %v4430_v24 }
 0x421   :  { %3609 = vmatpush3.msra.mxu0 %v4433_v28  ;;  %3619 = vmatprep.subr.mxu1 %v4151_v0 }
 0x422   :  { %3610 = vmatprep.subr.mxu0 %v4151_v0  ;;  %3620 = vmatpush3.msra.mxu1 %v4438_v30 }
 0x423   :  { %3611 = vmatpush3.msra.mxu0 %v4441_v31  ;;  %3621 = vmatprep.subr.mxu1 %v4151_v0 }
 0x424   :  { %3613 = vmatmul.mubr.msk.f32.vlgmr.msra.gmra.mxu0 %vm156_vm2, %v4265_v16  ;;  %3622 = vmatpush3.msra.mxu1 %v4446_v32 }
 0x425   :  { %3623 = vmatprep.mubr.msk.f32.mxu1 %vm4152_vm0, %v4151_v0  ;;  %3626 = vmatprep.subr.mxu0 %v4151_v0 }
 0x426   :  { %3624 = vmatmul.mubr.msk.f32.vlgmr.msra.gmra.mxu1 %vm156_vm2, %v4265_v16  ;;  %3627 = vmatpush3.msra.mxu0 %v4243_v8 }
 0x427   :  { %3628 = vmatprep.subr.mxu0 %v4151_v0  ;;  %3634 = vmatprep.mubr.msk.f32.mxu0 %vm4152_vm0, %v4151_v0 }
 0x428   :  { %3629 = vmatpush3.msra.mxu0 %v4248_v10  ;;  %3637 = vmatprep.subr.mxu1 %v4151_v0 }
 0x429   :  { %3630 = vmatprep.subr.mxu0 %v4151_v0  ;;  %3638 = vmatpush3.msra.mxu1 %v4341_v35 }
 0x42a   :  { %3631 = vmatpush3.msra.mxu0 %v4252_v12  ;;  %3639 = vmatprep.subr.mxu1 %v4151_v0 }
 0x42b   :  { %3632 = vmatprep.subr.mxu0 %v4151_v0  ;;  %3640 = vmatpush3.msra.mxu1 %v4349_v37 }
 0x42c   :  { %3633 = vmatpush3.msra.mxu0 %v4258_v14  ;;  %3641 = vmatprep.subr.mxu1 %v4151_v0 }
 0x42d   :  { %3648 = vmatprep.subr.mxu0 %v4151_v0  ;;  %3642 = vmatpush3.msra.mxu1 %v4357_v3 }
 0x42e   :  { %3643 = vmatprep.subr.mxu1 %v4151_v0  ;;  %3645 = vmatprep.mubr.msk.f32.mxu1 %vm4152_vm0, %v4151_v0 }
 0x42f   :  { %3644 = vmatpush3.msra.mxu1 %v4365_v42 }
 0x430   :  { %3659 = vmatprep.subr.mxu1 %v4151_v0 }
 0x4d2   :  { %v762_v47 = vpop.f32.mrf.mxu0  ;;  %v833_v48 = vpop.f32.mrf.mxu1 }
 0x4d3   :  { %v766_v59 = vadd.f32 %v762_v47, %v4488_v55  ;;  %v837_v47 = vadd.f32 %v833_v48, %v4499_v17  ;;  %v401_v48 = vrot.slane %v4296_v29, %v400_v63 }
 0x4d4   :  { %v3570_v49 = vpop.f32.mrf.mxu0  ;;  %v3581_v50 = vpop.f32.mrf.mxu1 }
 0x4db   :  { %v904_v57 = vpop.f32.mrf.mxu0  ;;  %v979_v58 = vpop.f32.mrf.mxu1 }
 0x4dc   :  { %v980_v60 = vadd.f32 %v979_v58, %v4485_v53 }
 0x4dd   :  { %v3592_v61 = vpop.f32.mrf.mxu0  ;;  %v3603_v62 = vpop.f32.mrf.mxu1 }
 0x4de   :  { %v1131_v1 = vadd.f32 %v980_v60, %v766_v59  ;;  %v1059_v62 = vsub.s32 7, %v4285_v25 }
 0x4e0   :  { %v3326_v34 = vmul.f32 -1.442695, %v1131_v1  ;;  %v4506_v22 = vrot.slane %v4296_v29, %v1059_v62 }
 0x4e2   :  { %3893 = vpow2.f32 %v3326_v34 }
 0x4e4   :  { %v1053_v49 = vpop.f32.mrf.mxu0 }
 0x4e5   :  { %v1054_v50 = vadd.f32 %v1053_v49, %v4496_v46  ;;  %v4510_v49 = vadd.f32 %v468_v33, %v401_v48 }
 0x4e6   :  { %v3614_v51 = vpop.f32.mrf.mxu0  ;;  %v1127_v52 = vpop.f32.mrf.mxu1 }
 0x4e7   :  { %v1138_v58 = vadd.f32 %v1054_v50, %v837_v47  ;;  %v1128_v34 = vadd.f32 %v1127_v52, %v4506_v22  ;;  %v908_v50 = vadd.f32 %v904_v57, %v4510_v49 }
 0x4e8   :  { %v3625_v61 = vpop.f32.mrf.mxu1 }
 0x4e9   :  { %v3327_v59 = vmul.f32 -1.442695, %v1138_v58 }
 0x4eb   :  { %3895 = vpow2.f32 %v3327_v59 }
 0x4ef   :  { %v3894_v56 = vpop.eup %3893 }
 0x4f0   :  { %v1135_v60 = vadd.f32 1.0, %v3894_v56 }
 0x4f2   :  { %3897 = vrcp.f32 %v1135_v60 }
 0x4f8   :  { %v3896_v1 = vpop.eup %3895 }
 0x4f9   :  { %v1142_v5 = vadd.f32 1.0, %v3896_v1 }
 0x4fb   :  { %3899 = vrcp.f32 %v1142_v5 }
 0x4ff   :  { %v3898_v47 = vpop.eup %3897 }
 0x500   :  { %v1145_v51 = vmul.f32 %v3898_v47, %v1128_v34 }
 0x502   :  { %v1146_v58 = vadd.f32 %v1145_v51, %v908_v50 }
 0x504   :  { %3901 = vtanh.f32 %v1146_v58 }
 0x508   :  { %v3900_v61 = vpop.eup %3899 }
 0x509   :  { %v1148_v25 = vsub.f32 1.0, %v3900_v61  ;;  %v1150_v60 = vmul.f32 %v3900_v61, %v4265_v16 }
 0x511   :  { %v3902_v59 = vpop.eup %3901 }
 0x512   :  { %v1149_v56 = vmul.f32 %v3902_v59, %v1148_v25 }
 0x514   :  { %v4514_v62 = vadd.f32 %v1150_v60, %v1149_v56 }
 0x516   :  { %3635 = vmatmul.mubr.msk.f32.vlgmr.msra.gmra.mxu0 %vm156_vm2, %v4514_v62 }
 0x517   :  { %3649 = vmatpush3.msra.mxu0 %v4343_v36  ;;  %3656 = vmatprep.mubr.msk.f32.mxu0 %vm4152_vm0, %v4151_v0 }
 0x518   :  { %3650 = vmatprep.subr.mxu0 %v4151_v0 }
 0x519   :  { %3651 = vmatpush3.msra.mxu0 %v4351_v38 }
 0x51a   :  { %3652 = vmatprep.subr.mxu0 %v4151_v0 }
 0x51b   :  { %3653 = vmatpush3.msra.mxu0 %v4359_v41 }
 0x51c   :  { %3654 = vmatprep.subr.mxu0 %v4151_v0 }
 0x51d   :  { %3655 = vmatpush3.msra.mxu0 %v4367_v43 }
 0x51e   :  { %3670 = vmatprep.subr.mxu0 %v4151_v0 }
 0x5d6   :  { %v1221_v16 = vpop.f32.mrf.mxu0 }
 0x5d7   :  { %v1232_v29 = vrot.slane %v1221_v16, %v4291_v27 }
 0x5d8   :  { %v3636_v33 = vpop.f32.mrf.mxu0 }
 0x5d9   :  { %v1233_v57 = vcombine.high %v1232_v29, %v1232_v29  ;;  %v1240_v52 = vrot.slane %v1232_v29, %v4291_v27 }
 0x5db   :  { %v1247_v63 = vrot.slane %v1233_v57, %v4291_v27  ;;  %v1251_v1 = vrot.slane %v1240_v52, %v4288_v26 }
 0x5dd   :  { %v1255_v48 = vrot.slane %v1247_v63, %v4288_v26  ;;  %v1258_v5 = vadd.f32 %v1251_v1, %v4304_v39 }
 0x5df   :  { %v1259_v34 = vadd.f32 %v1255_v48, %v4306_v40  ;;  %3903 = vtanh.f32 %v1258_v5 }
 0x5e1   :  { %3905 = vtanh.f32 %v1259_v34 }
 0x5ec   :  { %v3904_v47 = vpop.eup %3903 }
 0x5ed   :  { %v1262_v50 = vmul.f32 %v3904_v47, %v4316_v45 }
 0x5ee   :  { %v3906_v51 = vpop.eup %3905 }
 0x5ef   :  { %v1264_v58 = vsel %vm156_vm2, %v1262_v50, 0.0  ;;  %v1263_v61 = vmul.f32 %v3906_v51, %v4316_v45 }
 0x5f0   :  { %1265 = vadd.xlane.f32.xlu1 %v1264_v58 }
 0x5f1   :  { %v1267_v25 = vsel %vm156_vm2, %v1263_v61, 0.0 }
 0x5f2   :  { %1268 = vadd.xlane.f32.xlu0 %v1267_v25 }
 0x679   :  { %v1266_v59 = vpop.xlane.xlu1 %1265 }
 0x67a   :  { %v1275_v60 = vrot.slane %v1266_v59, %v4323_v54 }
 0x67b   :  { %v1269_v56 = vpop.xlane.xlu0 %1268 }
 0x67c   :  { %v1279_v16 = vrot.slane %v1269_v56, %v4323_v54 }
 0x67e   :  { %v1280_v29 = vsel %vm606_vm3, %v1279_v16, %v1275_v60 }
 0x67f   :  { %v1282_v33 = vsel %vm609_vm4, %v1280_v29, -inf }
 0x680   :  { %1283 = vmax.xlane.f32.xlu1 %v1282_v33 }
 0x709   :  { %v1284_v57 = vpop.xlane.xlu1 %1283 }
 0x70a   :  { %v1289_v52 = vrot.slane %v1284_v57, %v4288_v26  ;;  %v1293_v63 = vrot.slane %v1284_v57, %v4312_v44 }
 0x70c   :  { %v1296_v1 = vsub.f32 %v1266_v59, %v1289_v52  ;;  %v1297_v48 = vsub.f32 %v1269_v56, %v1293_v63 }
 0x70e   :  { %v1298_v5 = vmul.f32 1.442695, %v1296_v1  ;;  %v1300_v34 = vmul.f32 1.442695, %v1297_v48 }
 0x710   :  { %3907 = vpow2.f32 %v1298_v5 }
 0x711   :  { %3909 = vpow2.f32 %v1300_v34 }
 0x71d   :  { %v3908_v47 = vpop.eup %3907 }
 0x71e   :  { %1305 = vperm.xlu1 %3881, %v3908_v47   ;;  %v3910_v50 = vpop.eup %3909 }
 0x722   :  { %1308 = vperm.xlu1 %3881, %v3910_v50  }
 0x799   :  { %v1306_v51 = vpop.permute.xlu1 %1305 }
 0x79a   :  { %v1313_v61 = vrot.slane %v1306_v51, %v4323_v54 }
 0x79d   :  { %v1309_v58 = vpop.permute.xlu1 %1308 }
 0x79e   :  { %v1317_v25 = vrot.slane %v1309_v58, %v4323_v54 }
 0x7a0   :  { %v1318_v60 = vsel %vm606_vm3, %v1317_v25, %v1313_v61 }
 0x7a1   :  { %v1320_v16 = vsel %vm609_vm4, %v1318_v60, 0.0 }
 0x7a2   :  { %1321 = vadd.xlane.f32.xlu1 %v1320_v16 }
 0x82b   :  { %v1322_v59 = vpop.xlane.xlu1 %1321 }
 0x82c   :  { %3911 = vrcp.f32 %v1322_v59 }
 0x839   :  { %v3912_v56 = vpop.eup %3911 }
 0x83a   :  { %v1328_v29 = vrot.slane %v3912_v56, %v4288_v26  ;;  %v1332_v57 = vrot.slane %v3912_v56, %v4312_v44 }
 0x83c   :  { %v1335_v33 = vmul.f32 %v3908_v47, %v1328_v29  ;;  %v1336_v52 = vmul.f32 %v3910_v50, %v1332_v57 }
 0x83e   :  { %1339 = vperm.xlu0 %3882, %v1335_v33  }
 0x842   :  { %1344 = vperm.xlu0 %3882, %v1336_v52  }
 0x8b9   :  { %v1340_v63 = vpop.permute.xlu0 %1339 }
 0x8ba   :  { %v1347_v1 = vmul.f32 %v1340_v63, %v4254_v13 }
 0x8bc   :  { %v1349_v48 = vsel %vm156_vm2, %v1347_v1, 0.0 }
 0x8bd   :  { %v1350_v5 = vrot.slane %v1349_v48, 4  ;;  %v1345_v34 = vpop.permute.xlu0 %1344 }
 0x8be   :  { %v1348_v51 = vmul.f32 %v1345_v34, %v4260_v15 }
 0x8bf   :  { %v1351_v58 = vadd.f32 %v1350_v5, %v1349_v48 }
 0x8c0   :  { %v1356_v61 = vsel %vm156_vm2, %v1348_v51, 0.0 }
 0x8c1   :  { %v1352_v25 = vrot.slane %v1351_v58, 2  ;;  %v1357_v60 = vrot.slane %v1356_v61, 4 }
 0x8c3   :  { %v1353_v47 = vadd.f32 %v1352_v25, %v1351_v58  ;;  %v1358_v16 = vadd.f32 %v1357_v60, %v1356_v61 }
 0x8c5   :  { %v1359_v59 = vrot.slane %v1358_v16, 2  ;;  %v1354_v56 = vrot.slane %v1353_v47, 1 }
 0x8c7   :  { %v1360_v50 = vadd.f32 %v1359_v59, %v1358_v16  ;;  %v1355_v33 = vadd.f32 %v1354_v56, %v1353_v47 }
 0x8c9   :  { %v1361_v29 = vrot.slane %v1360_v50, 1 }
 0x8cb   :  { %v1362_v57 = vadd.f32 %v1361_v29, %v1360_v50 }
 0x8cd   :  { %v1365_v13 = vsel %vm606_vm3, %v1362_v57, %v1355_v33 }
 0x8ce   :  { %3646 = vmatmul.mubr.msk.f32.vlgmr.msra.gmra.mxu1 %vm156_vm2, %v1365_v13  ;;  %3657 = vmatmul.mubr.msk.f32.vlgmr.msra.gmra.mxu0 %vm156_vm2, %v1365_v13 }
 0x8cf   :  { %3660 = vmatpush3.msra.mxu1 %v4379_v2  ;;  %3671 = vmatpush3.msra.mxu0 %v4381_v4 }
 0x8d0   :  { %3661 = vmatprep.subr.mxu1 %v4151_v0  ;;  %3672 = vmatprep.subr.mxu0 %v4151_v0 }
 0x8d1   :  { %3662 = vmatpush3.msra.mxu1 %v4386_v6  ;;  %3673 = vmatpush3.msra.mxu0 %v4388_v7 }
 0x8d2   :  { %3663 = vmatprep.subr.mxu1 %v4151_v0  ;;  %3674 = vmatprep.subr.mxu0 %v4151_v0 }
 0x8d3   :  { %3664 = vmatpush3.msra.mxu1 %v4394_v9  ;;  %3675 = vmatpush3.msra.mxu0 %v4396_v11 }
 0x8d4   :  { %3665 = vmatprep.subr.mxu1 %v4151_v0  ;;  %3676 = vmatprep.subr.mxu0 %v4151_v0 }
 0x8d5   :  { %3666 = vmatpush3.msra.mxu1 %v4402_v18  ;;  %3667 = vmatprep.mubr.msk.f32.mxu1 %vm4152_vm0, %v4151_v0 }
 0x8d6   :  { %3677 = vmatpush3.msra.mxu0 %v4406_v19  ;;  %3678 = vmatprep.mubr.msk.f32.mxu0 %vm4152_vm0, %v4151_v0 }
 0x8d7   :  { %3668 = vmatmul.mubr.msk.f32.vlgmr.msra.gmra.mxu1 %vm156_vm2, %v1365_v13  ;;  %3679 = vmatmul.mubr.msk.f32.vlgmr.msra.gmra.mxu0 %vm156_vm2, %v4514_v62 }
 0x8d8   :  { %3681 = vmatprep.subr.mxu1 %v4151_v0  ;;  %3692 = vmatprep.subr.mxu0 %v4151_v0 }
 0x8d9   :  { %3682 = vmatpush3.msra.mxu1 %v4416_v20  ;;  %3693 = vmatpush3.msra.mxu0 %v4421_v21 }
 0x8da   :  { %3683 = vmatprep.subr.mxu1 %v4151_v0  ;;  %3694 = vmatprep.subr.mxu0 %v4151_v0 }
 0x8db   :  { %3684 = vmatpush3.msra.mxu1 %v4424_v23  ;;  %3695 = vmatpush3.msra.mxu0 %v4430_v24 }
 0x8dc   :  { %3685 = vmatprep.subr.mxu1 %v4151_v0  ;;  %3696 = vmatprep.subr.mxu0 %v4151_v0 }
 0x8dd   :  { %3686 = vmatpush3.msra.mxu1 %v4433_v28  ;;  %3697 = vmatpush3.msra.mxu0 %v4438_v30 }
 0x8de   :  { %3687 = vmatprep.subr.mxu1 %v4151_v0  ;;  %3698 = vmatprep.subr.mxu0 %v4151_v0 }
 0x8df   :  { %3688 = vmatpush3.msra.mxu1 %v4441_v31  ;;  %3689 = vmatprep.mubr.msk.f32.mxu1 %vm4152_vm0, %v4151_v0 }
 0x8e0   :  { %3699 = vmatpush3.msra.mxu0 %v4446_v32  ;;  %3700 = vmatprep.mubr.msk.f32.mxu0 %vm4152_vm0, %v4151_v0 }
 0x8e1   :  { %3690 = vmatmul.mubr.msk.f32.vlgmr.msra.gmra.mxu1 %vm156_vm2, %v4514_v62  ;;  %3701 = vmatmul.mubr.msk.f32.vlgmr.msra.gmra.mxu0 %vm156_vm2, %v4514_v62 }
 0x8e2   :  { %3703 = vmatprep.subr.mxu1 %v4151_v0  ;;  %3711 = vmatprep.mubr.msk.f32.mxu1 %vm4152_vm0, %v4151_v0 }
 0x8e3   :  { %3704 = vmatpush3.msra.mxu1 %v4243_v8  ;;  %3714 = vmatprep.subr.mxu0 %v4151_v0 }
 0x8e4   :  { %3705 = vmatprep.subr.mxu1 %v4151_v0  ;;  %3715 = vmatpush3.msra.mxu0 %v4341_v35 }
 0x8e5   :  { %3706 = vmatpush3.msra.mxu1 %v4248_v10  ;;  %3716 = vmatprep.subr.mxu0 %v4151_v0 }
 0x8e6   :  { %3707 = vmatprep.subr.mxu1 %v4151_v0  ;;  %3717 = vmatpush3.msra.mxu0 %v4349_v37 }
 0x8e7   :  { %3708 = vmatpush3.msra.mxu1 %v4252_v12  ;;  %3718 = vmatprep.subr.mxu0 %v4151_v0 }
 0x8e8   :  { %3709 = vmatprep.subr.mxu1 %v4151_v0  ;;  %3719 = vmatpush3.msra.mxu0 %v4357_v3 }
 0x8e9   :  { %3710 = vmatpush3.msra.mxu1 %v4258_v14  ;;  %3720 = vmatprep.subr.mxu0 %v4151_v0 }
 0x8ea   :  { %3725 = vmatprep.subr.mxu1 %v4151_v0  ;;  %3721 = vmatpush3.msra.mxu0 %v4365_v42 }
 0x8eb   :  { %3722 = vmatprep.mubr.msk.f32.mxu0 %vm4152_vm0, %v4151_v0  ;;  %3736 = vmatprep.subr.mxu0 %v4151_v0 }
 0x98e   :  { %v1434_v8 = vpop.f32.mrf.mxu1  ;;  %v1508_v10 = vpop.f32.mrf.mxu0 }
 0x98f   :  { %v1439_v52 = vrot.slane %v1434_v8, 6  ;;  %v1513_v25 = vrot.slane %v1508_v10, 6 }
 0x990   :  { %v3647_v12 = vpop.f32.mrf.mxu1  ;;  %v3658_v15 = vpop.f32.mrf.mxu0 }
 0x991   :  { %v1441_v34 = vadd.f32 %v1439_v52, %v4488_v55  ;;  %v1515_v50 = vadd.f32 %v1513_v25, %v4499_v17 }
 0x997   :  { %v1582_v63 = vpop.f32.mrf.mxu1  ;;  %v1656_v1 = vpop.f32.mrf.mxu0 }
 0x998   :  { %v1657_v14 = vadd.f32 %v1656_v1, %v4485_v53  ;;  %v1587_v10 = vrot.slane %v1582_v63, 6 }
 0x999   :  { %v3669_v48 = vpop.f32.mrf.mxu1  ;;  %v3680_v5 = vpop.f32.mrf.mxu0 }
 0x99a   :  { %v1801_v51 = vrot.slane %v1657_v14, 6  ;;  %v1589_v48 = vadd.f32 %v1587_v10, %v4510_v49 }
 0x99c   :  { %v1803_v58 = vadd.f32 %v1801_v51, %v1441_v34 }
 0x99e   :  { %v3335_v61 = vmul.f32 -1.442695, %v1803_v58 }
 0x9a0   :  { %3913 = vpow2.f32 %v3335_v61  ;;  %v1828_v61 = vrot.slane %v4514_v62, 6 }
 0x9a1   :  { %v1726_v60 = vpop.f32.mrf.mxu1  ;;  %v1796_v47 = vpop.f32.mrf.mxu0 }
 0x9a2   :  { %v1727_v16 = vadd.f32 %v1726_v60, %v4496_v46  ;;  %v1797_v15 = vadd.f32 %v1796_v47, %v4506_v22 }
 0x9a3   :  { %v3691_v59 = vpop.f32.mrf.mxu1  ;;  %v3702_v56 = vpop.f32.mrf.mxu0 }
 0x9a4   :  { %v1811_v29 = vrot.slane %v1727_v16, 6  ;;  %v1821_v1 = vrot.slane %v1797_v15, 6 }
 0x9a6   :  { %v1813_v33 = vadd.f32 %v1811_v29, %v1515_v50 }
 0x9a8   :  { %v3336_v57 = vmul.f32 -1.442695, %v1813_v33 }
 0x9aa   :  { %3915 = vpow2.f32 %v3336_v57 }
 0x9ad   :  { %v3914_v13 = vpop.eup %3913 }
 0x9ae   :  { %v1807_v8 = vadd.f32 1.0, %v3914_v13 }
 0x9b0   :  { %3917 = vrcp.f32 %v1807_v8 }
 0x9b7   :  { %v3916_v12 = vpop.eup %3915 }
 0x9b8   :  { %v1817_v52 = vadd.f32 1.0, %v3916_v12 }
 0x9ba   :  { %3919 = vrcp.f32 %v1817_v52 }
 0x9bd   :  { %v3918_v14 = vpop.eup %3917 }
 0x9be   :  { %v1823_v5 = vmul.f32 %v3918_v14, %v1821_v1 }
 0x9c0   :  { %v1824_v34 = vadd.f32 %v1823_v5, %v1589_v48 }
 0x9c2   :  { %3921 = vtanh.f32 %v1824_v34 }
 0x9c7   :  { %v3920_v51 = vpop.eup %3919 }
 0x9c8   :  { %v1826_v58 = vsub.f32 1.0, %v3920_v51  ;;  %v1830_v16 = vmul.f32 %v3920_v51, %v1828_v61 }
 0x9cf   :  { %v3922_v25 = vpop.eup %3921 }
 0x9d0   :  { %v1827_v60 = vmul.f32 %v3922_v25, %v1826_v58 }
 0x9d2   :  { %v4632_v59 = vadd.f32 %v1830_v16, %v1827_v60 }
 0x9d4   :  { %v4635_v63 = vrot.slane %v4632_v59, 2 }
 0x9d6   :  { %3712 = vmatmul.mubr.msk.f32.vlgmr.msra.gmra.mxu1 %vm156_vm2, %v4635_v63 }
 0x9d7   :  { %3726 = vmatpush3.msra.mxu1 %v4343_v36  ;;  %3733 = vmatprep.mubr.msk.f32.mxu1 %vm4152_vm0, %v4151_v0 }
 0x9d8   :  { %3727 = vmatprep.subr.mxu1 %v4151_v0 }
 0x9d9   :  { %3728 = vmatpush3.msra.mxu1 %v4351_v38 }
 0x9da   :  { %3729 = vmatprep.subr.mxu1 %v4151_v0 }
 0x9db   :  { %3730 = vmatpush3.msra.mxu1 %v4359_v41 }
 0x9dc   :  { %3731 = vmatprep.subr.mxu1 %v4151_v0 }
 0x9dd   :  { %3732 = vmatpush3.msra.mxu1 %v4367_v43 }
 0x9de   :  { %3747 = vmatprep.subr.mxu1 %v4151_v0 }
 0xa96   :  { %v1902_v47 = vpop.f32.mrf.mxu1 }
 0xa97   :  { %v1913_v36 = vrot.slane %v1902_v47, %v4291_v27 }
 0xa98   :  { %v3713_v56 = vpop.f32.mrf.mxu1 }
 0xa99   :  { %v1914_v50 = vcombine.high %v1913_v36, %v1913_v36  ;;  %v1921_v29 = vrot.slane %v1913_v36, %v4291_v27 }
 0xa9b   :  { %v1928_v33 = vrot.slane %v1914_v50, %v4291_v27  ;;  %v1932_v38 = vrot.slane %v1921_v29, %v4288_v26 }
 0xa9d   :  { %v1936_v57 = vrot.slane %v1928_v33, %v4288_v26  ;;  %v1939_v41 = vadd.f32 %v1932_v38, %v4304_v39 }
 0xa9f   :  { %v1940_v13 = vadd.f32 %v1936_v57, %v4306_v40  ;;  %3923 = vtanh.f32 %v1939_v41 }
 0xaa1   :  { %3925 = vtanh.f32 %v1940_v13 }
 0xaac   :  { %v3924_v43 = vpop.eup %3923 }
 0xaad   :  { %v1943_v8 = vmul.f32 %v3924_v43, %v4316_v45 }
 0xaae   :  { %v3926_v12 = vpop.eup %3925 }
 0xaaf   :  { %v1945_v15 = vsel %vm156_vm2, %v1943_v8, 0.0  ;;  %v1944_v10 = vmul.f32 %v3926_v12, %v4316_v45 }
 0xab0   :  { %1946 = vadd.xlane.f32.xlu0 %v1945_v15 }
 0xab1   :  { %v1948_v52 = vsel %vm156_vm2, %v1944_v10, 0.0 }
 0xab2   :  { %1949 = vadd.xlane.f32.xlu1 %v1948_v52 }
 0xb39   :  { %v1947_v1 = vpop.xlane.xlu0 %1946 }
 0xb3a   :  { %v1956_v48 = vrot.slane %v1947_v1, %v4323_v54 }
 0xb3b   :  { %v1950_v14 = vpop.xlane.xlu1 %1949 }
 0xb3c   :  { %v1960_v5 = vrot.slane %v1950_v14, %v4323_v54 }
 0xb3e   :  { %v1961_v34 = vsel %vm606_vm3, %v1960_v5, %v1956_v48  ;;  %v4672_v48 = vld [vmem:[#allocation5 + $0x8] sm:$0xff] }
 0xb3f   :  { %v1963_v51 = vsel %vm609_vm4, %v1961_v34, -inf  ;;  %v4675_v34 = vld [vmem:[#allocation5] sm:$0xff] }
 0xb40   :  { %1964 = vmax.xlane.f32.xlu1 %v1963_v51 }
 0xbc9   :  { %v1965_v58 = vpop.xlane.xlu1 %1964 }
 0xbca   :  { %v1970_v61 = vrot.slane %v1965_v58, %v4288_v26  ;;  %v1974_v25 = vrot.slane %v1965_v58, %v4312_v44 }
 0xbcc   :  { %v1977_v60 = vsub.f32 %v1947_v1, %v1970_v61  ;;  %v1978_v16 = vsub.f32 %v1950_v14, %v1974_v25 }
 0xbce   :  { %v1979_v47 = vmul.f32 1.442695, %v1977_v60  ;;  %v1981_v36 = vmul.f32 1.442695, %v1978_v16 }
 0xbd0   :  { %3927 = vpow2.f32 %v1979_v47 }
 0xbd1   :  { %3929 = vpow2.f32 %v1981_v36 }
 0xbdd   :  { %v3928_v56 = vpop.eup %3927 }
 0xbde   :  { %1986 = vperm.xlu1 %3881, %v3928_v56   ;;  %v3930_v50 = vpop.eup %3929 }
 0xbe2   :  { %1989 = vperm.xlu1 %3881, %v3930_v50  }
 0xc59   :  { %v1987_v29 = vpop.permute.xlu1 %1986 }
 0xc5a   :  { %v1994_v38 = vrot.slane %v1987_v29, %v4323_v54 }
 0xc5d   :  { %v1990_v33 = vpop.permute.xlu1 %1989 }
 0xc5e   :  { %v1998_v57 = vrot.slane %v1990_v33, %v4323_v54 }
 0xc60   :  { %v1999_v41 = vsel %vm606_vm3, %v1998_v57, %v1994_v38 }
 0xc61   :  { %v2001_v13 = vsel %vm609_vm4, %v1999_v41, 0.0 }
 0xc62   :  { %2002 = vadd.xlane.f32.xlu0 %v2001_v13 }
 0xceb   :  { %v2003_v43 = vpop.xlane.xlu0 %2002 }
 0xcec   :  { %3931 = vrcp.f32 %v2003_v43 }
 0xcf9   :  { %v3932_v8 = vpop.eup %3931 }
 0xcfa   :  { %v2013_v12 = vrot.slane %v3932_v8, %v4312_v44  ;;  %v2009_v15 = vrot.slane %v3932_v8, %v4288_v26 }
 0xcfc   :  { %v2017_v10 = vmul.f32 %v3930_v50, %v2013_v12  ;;  %v2016_v52 = vmul.f32 %v3928_v56, %v2009_v15 }
 0xcfe   :  { %2025 = vperm.xlu0 %3882, %v2017_v10   ;;  %2020 = vperm.xlu1 %3881, %v2016_v52  }
 0xd79   :  { %v2026_v1 = vpop.permute.xlu0 %2025  ;;  %v2021_v14 = vpop.permute.xlu1 %2020 }
 0xd7a   :  { %v2029_v5 = vmul.f32 %v4672_v48, %v2026_v1  ;;  %v2028_v51 = vmul.f32 %v4675_v34, %v2021_v14 }
 0xd7c   :  { %v2037_v58 = vsel %vm156_vm2, %v2029_v5, 0.0  ;;  %v2030_v61 = vsel %vm156_vm2, %v2028_v51, 0.0 }
 0xd7d   :  { %v2038_v25 = vrot.slane %v2037_v58, 4  ;;  %v2031_v60 = vrot.slane %v2030_v61, 4 }
 0xd7f   :  { %v2039_v16 = vadd.f32 %v2038_v25, %v2037_v58  ;;  %v2032_v47 = vadd.f32 %v2031_v60, %v2030_v61 }
 0xd81   :  { %v2040_v36 = vrot.slane %v2039_v16, 2  ;;  %v2033_v56 = vrot.slane %v2032_v47, 2 }
 0xd83   :  { %v2041_v50 = vadd.f32 %v2040_v36, %v2039_v16  ;;  %v2034_v29 = vadd.f32 %v2033_v56, %v2032_v47 }
 0xd85   :  { %v2042_v33 = vrot.slane %v2041_v50, 1  ;;  %v2035_v38 = vrot.slane %v2034_v29, 1 }
 0xd87   :  { %v2043_v57 = vadd.f32 %v2042_v33, %v2041_v50  ;;  %v2036_v41 = vadd.f32 %v2035_v38, %v2034_v29  ;;  %v2509_v33 = vrot.slane %v4632_v59, 6 }
 0xd89   :  { %v2046_v13 = vsel %vm606_vm3, %v2043_v57, %v2036_v41 }
 0xd8a   :  { %3723 = vmatmul.mubr.msk.f32.vlgmr.msra.gmra.mxu0 %vm156_vm2, %v2046_v13  ;;  %3734 = vmatmul.mubr.msk.f32.vlgmr.msra.gmra.mxu1 %vm156_vm2, %v2046_v13 }
 0xd8b   :  { %3737 = vmatpush3.msra.mxu0 %v4379_v2  ;;  %3748 = vmatpush3.msra.mxu1 %v4381_v4  ;;  %v3969_v2 = vld [vmem:[#allocation8 + $0x38] sm:$0xff]  ;;  %v3970_v4 = vld [vmem:[#allocation8 + $0x30] sm:$0xff] }
 0xd8c   :  { %3738 = vmatprep.subr.mxu0 %v4151_v0  ;;  %3749 = vmatprep.subr.mxu1 %v4151_v0 }
 0xd8d   :  { %3739 = vmatpush3.msra.mxu0 %v4386_v6  ;;  %3750 = vmatpush3.msra.mxu1 %v4388_v7  ;;  %v3971_v6 = vld [vmem:[#allocation8 + $0x28] sm:$0xff]  ;;  %v3972_v7 = vld [vmem:[#allocation8 + $0x20] sm:$0xff] }
 0xd8e   :  { %3740 = vmatprep.subr.mxu0 %v4151_v0  ;;  %3751 = vmatprep.subr.mxu1 %v4151_v0 }
 0xd8f   :  { %3741 = vmatpush3.msra.mxu0 %v4394_v9  ;;  %3752 = vmatpush3.msra.mxu1 %v4396_v11 }
 0xd90   :  { %3742 = vmatprep.subr.mxu0 %v4151_v0  ;;  %3753 = vmatprep.subr.mxu1 %v4151_v0 }
 0xd91   :  { %3743 = vmatpush3.msra.mxu0 %v4402_v18  ;;  %3744 = vmatprep.mubr.msk.f32.mxu0 %vm4152_vm0, %v4151_v0 }
 0xd92   :  { %3754 = vmatpush3.msra.mxu1 %v4406_v19  ;;  %3755 = vmatprep.mubr.msk.f32.mxu1 %vm4152_vm0, %v4151_v0 }
 0xd93   :  { %3745 = vmatmul.mubr.msk.f32.vlgmr.msra.gmra.mxu0 %vm156_vm2, %v2046_v13  ;;  %3756 = vmatmul.mubr.msk.f32.vlgmr.msra.gmra.mxu1 %vm156_vm2, %v4635_v63 }
 0xd94   :  { %3758 = vmatprep.subr.mxu0 %v4151_v0  ;;  %3769 = vmatprep.subr.mxu1 %v4151_v0 }
 0xd95   :  { %3759 = vmatpush3.msra.mxu0 %v4416_v20  ;;  %3770 = vmatpush3.msra.mxu1 %v4421_v21 }
 0xd96   :  { %3760 = vmatprep.subr.mxu0 %v4151_v0  ;;  %3771 = vmatprep.subr.mxu1 %v4151_v0 }
 0xd97   :  { %3761 = vmatpush3.msra.mxu0 %v4424_v23  ;;  %3772 = vmatpush3.msra.mxu1 %v4430_v24 }
 0xd98   :  { %3762 = vmatprep.subr.mxu0 %v4151_v0  ;;  %3773 = vmatprep.subr.mxu1 %v4151_v0 }
 0xd99   :  { %3763 = vmatpush3.msra.mxu0 %v4433_v28  ;;  %3774 = vmatpush3.msra.mxu1 %v4438_v30 }
 0xd9a   :  { %3764 = vmatprep.subr.mxu0 %v4151_v0  ;;  %3775 = vmatprep.subr.mxu1 %v4151_v0 }
 0xd9b   :  { %3765 = vmatpush3.msra.mxu0 %v4441_v31  ;;  %3766 = vmatprep.mubr.msk.f32.mxu0 %vm4152_vm0, %v4151_v0 }
 0xd9c   :  { %3776 = vmatpush3.msra.mxu1 %v4446_v32  ;;  %3777 = vmatprep.mubr.msk.f32.mxu1 %vm4152_vm0, %v4151_v0 }
 0xd9d   :  { %3767 = vmatmul.mubr.msk.f32.vlgmr.msra.gmra.mxu0 %vm156_vm2, %v4635_v63  ;;  %3778 = vmatmul.mubr.msk.f32.vlgmr.msra.gmra.mxu1 %vm156_vm2, %v4635_v63 }
 0xd9e   :  { %3780 = vmatprep.subr.mxu0 %v4151_v0  ;;  %3788 = vmatprep.mubr.msk.f32.mxu0 %vm4152_vm0, %v4151_v0 }
 0xd9f   :  { %3781 = vmatpush3.msra.mxu0 %v3969_v2  ;;  %3791 = vmatprep.subr.mxu1 %v4151_v0  ;;  %v3195_v2 = vsel %vm3194_vm5, %v4514_v62, %v4632_v59  ;;  %v3975_v62 = vld [vmem:[#allocation8 + $0x68] sm:$0xff]  ;;  %v3976_v59 = vld [vmem:[#allocation8 + $0x60] sm:$0xff] }
 0xda0   :  { %3782 = vmatprep.subr.mxu0 %v4151_v0  ;;  %3792 = vmatpush3.msra.mxu1 %v4341_v35 }
 0xda1   :  { %3783 = vmatpush3.msra.mxu0 %v3970_v4  ;;  %3793 = vmatprep.subr.mxu1 %v4151_v0 }
 0xda2   :  { %3784 = vmatprep.subr.mxu0 %v4151_v0  ;;  %3794 = vmatpush3.msra.mxu1 %v4349_v37 }
 0xda3   :  { %3785 = vmatpush3.msra.mxu0 %v3971_v6  ;;  %3795 = vmatprep.subr.mxu1 %v4151_v0 }
 0xda4   :  { %3786 = vmatprep.subr.mxu0 %v4151_v0  ;;  %3796 = vmatpush3.msra.mxu1 %v4357_v3 }
 0xda5   :  { %3787 = vmatpush3.msra.mxu0 %v3972_v7  ;;  %3797 = vmatprep.subr.mxu1 %v4151_v0  ;;  %v3973_v7 = vld [vmem:[#allocation8 + $0x78] sm:$0xff] }
 0xda6   :  { %3802 = vmatprep.subr.mxu0 %v4151_v0  ;;  %3798 = vmatpush3.msra.mxu1 %v4365_v42 }
 0xda7   :  { %3799 = vmatprep.mubr.msk.f32.mxu1 %vm4152_vm0, %v4151_v0  ;;  %3813 = vmatprep.subr.mxu1 %v4151_v0 }
 0xe4a   :  { %v2115_v35 = vpop.f32.mrf.mxu0  ;;  %v2189_v37 = vpop.f32.mrf.mxu1 }
 0xe4b   :  { %v2120_v18 = vrot.slane %v2115_v35, 4  ;;  %v2194_v31 = vrot.slane %v2189_v37, 4  ;;  %v3974_v35 = vld [vmem:[#allocation8 + $0x70] sm:$0xff] }
 0xe4c   :  { %v3724_v9 = vpop.f32.mrf.mxu0  ;;  %v3735_v11 = vpop.f32.mrf.mxu1 }
 0xe4d   :  { %v2122_v24 = vadd.f32 %v2120_v18, %v4488_v55  ;;  %v2196_v15 = vadd.f32 %v2194_v31, %v4499_v17 }
 0xe53   :  { %v2263_v19 = vpop.f32.mrf.mxu0  ;;  %v2337_v3 = vpop.f32.mrf.mxu1 }
 0xe54   :  { %v2338_v20 = vadd.f32 %v2337_v3, %v4485_v53  ;;  %v2268_v61 = vrot.slane %v2263_v19, 4 }
 0xe55   :  { %v3746_v21 = vpop.f32.mrf.mxu0  ;;  %v3757_v23 = vpop.f32.mrf.mxu1 }
 0xe56   :  { %v2482_v28 = vrot.slane %v2338_v20, 4  ;;  %v2270_v47 = vadd.f32 %v2268_v61, %v4510_v49 }
 0xe58   :  { %v2484_v42 = vadd.f32 %v2482_v28, %v2122_v24 }
 0xe5a   :  { %v3344_v30 = vmul.f32 -1.442695, %v2484_v42 }
 0xe5c   :  { %3933 = vpow2.f32 %v3344_v30 }
 0xe5d   :  { %v2407_v32 = vpop.f32.mrf.mxu0  ;;  %v2477_v63 = vpop.f32.mrf.mxu1 }
 0xe5e   :  { %v2408_v43 = vadd.f32 %v2407_v32, %v4496_v46  ;;  %v2478_v58 = vadd.f32 %v2477_v63, %v4506_v22 }
 0xe5f   :  { %v3768_v8 = vpop.f32.mrf.mxu0  ;;  %v3779_v12 = vpop.f32.mrf.mxu1 }
 0xe60   :  { %v2492_v10 = vrot.slane %v2408_v43, 4  ;;  %v2502_v60 = vrot.slane %v2478_v58, 4 }
 0xe62   :  { %v2494_v52 = vadd.f32 %v2492_v10, %v2196_v15 }
 0xe64   :  { %v3345_v1 = vmul.f32 -1.442695, %v2494_v52 }
 0xe66   :  { %3935 = vpow2.f32 %v3345_v1 }
 0xe69   :  { %v3934_v14 = vpop.eup %3933 }
 0xe6a   :  { %v2488_v5 = vadd.f32 1.0, %v3934_v14 }
 0xe6c   :  { %3937 = vrcp.f32 %v2488_v5 }
 0xe73   :  { %v3936_v51 = vpop.eup %3935 }
 0xe74   :  { %v2498_v25 = vadd.f32 1.0, %v3936_v51 }
 0xe76   :  { %3939 = vrcp.f32 %v2498_v25 }
 0xe79   :  { %v3938_v16 = vpop.eup %3937 }
 0xe7a   :  { %v2504_v36 = vmul.f32 %v3938_v16, %v2502_v60 }
 0xe7c   :  { %v2505_v56 = vadd.f32 %v2504_v36, %v2270_v47 }
 0xe7e   :  { %3941 = vtanh.f32 %v2505_v56 }
 0xe83   :  { %v3940_v50 = vpop.eup %3939 }
 0xe84   :  { %v2507_v29 = vsub.f32 1.0, %v3940_v50  ;;  %v2511_v41 = vmul.f32 %v3940_v50, %v2509_v33 }
 0xe8b   :  { %v3942_v38 = vpop.eup %3941 }
 0xe8c   :  { %v2508_v57 = vmul.f32 %v3942_v38, %v2507_v29 }
 0xe8e   :  { %v4753_v13 = vadd.f32 %v2511_v41, %v2508_v57 }
 0xe90   :  { %v4758_v4 = vrot.slane %v4753_v13, 4  ;;  %v4761_v6 = vsel %vm3196_vm6, %v3195_v2, %v4753_v13 }
 0xe92   :  { %3789 = vmatmul.mubr.msk.f32.vlgmr.msra.gmra.mxu0 %vm156_vm2, %v4758_v4 }
 0xe93   :  { %3803 = vmatpush3.msra.mxu0 %v3973_v7  ;;  %3810 = vmatprep.mubr.msk.f32.mxu0 %vm4152_vm0, %v4151_v0 }
 0xe94   :  { %3804 = vmatprep.subr.mxu0 %v4151_v0 }
 0xe95   :  { %3805 = vmatpush3.msra.mxu0 %v3974_v35 }
 0xe96   :  { %3806 = vmatprep.subr.mxu0 %v4151_v0 }
 0xe97   :  { %3807 = vmatpush3.msra.mxu0 %v3975_v62 }
 0xe98   :  { %3808 = vmatprep.subr.mxu0 %v4151_v0 }
 0xe99   :  { %3809 = vmatpush3.msra.mxu0 %v3976_v59 }
 0xe9a   :  { %3824 = vmatprep.subr.mxu0 %v4151_v0 }
 0xf52   :  { %v2583_v37 = vpop.f32.mrf.mxu0 }
 0xf53   :  { %v2594_v9 = vrot.slane %v2583_v37, %v4291_v27 }
 0xf54   :  { %v3790_v11 = vpop.f32.mrf.mxu0 }
 0xf55   :  { %v2595_v18 = vcombine.high %v2594_v9, %v2594_v9  ;;  %v2602_v19 = vrot.slane %v2594_v9, %v4291_v27 }
 0xf57   :  { %v2609_v3 = vrot.slane %v2595_v18, %v4291_v27  ;;  %v2613_v20 = vrot.slane %v2602_v19, %v4288_v26 }
 0xf59   :  { %v2617_v21 = vrot.slane %v2609_v3, %v4288_v26  ;;  %v2620_v23 = vadd.f32 %v2613_v20, %v4304_v39 }
 0xf5b   :  { %v2621_v24 = vadd.f32 %v2617_v21, %v4306_v40  ;;  %3943 = vtanh.f32 %v2620_v23 }
 0xf5d   :  { %3945 = vtanh.f32 %v2621_v24  ;;  %v3978_v24 = vld [vmem:[#allocation8 + $0xb8] sm:$0xff] }
 0xf68   :  { %v3944_v28 = vpop.eup %3943 }
 0xf69   :  { %v2624_v42 = vmul.f32 %v3944_v28, %v4316_v45  ;;  %v3979_v28 = vld [vmem:[#allocation8 + $0x90] sm:$0xff] }
 0xf6a   :  { %v3946_v30 = vpop.eup %3945 }
 0xf6b   :  { %v2626_v31 = vsel %vm156_vm2, %v2624_v42, 0.0  ;;  %v2625_v32 = vmul.f32 %v3946_v30, %v4316_v45  ;;  %v3980_v42 = vld [vmem:[#allocation8 + $0xb0] sm:$0xff]  ;;  %v3981_v30 = vld [vmem:[#allocation8 + $0x88] sm:$0xff] }
 0xf6c   :  { %2627 = vadd.xlane.f32.xlu1 %v2626_v31  ;;  %v3982_v31 = vld [vmem:[#allocation8 + $0xa8] sm:$0xff] }
 0xf6d   :  { %v2629_v27 = vsel %vm156_vm2, %v2625_v32, 0.0  ;;  %v3983_v32 = vld [vmem:[#allocation8 + $0x80] sm:$0xff] }
 0xf6e   :  { %2630 = vadd.xlane.f32.xlu0 %v2629_v27  ;;  %v3984_v27 = vld [vmem:[#allocation8 + $0xa0] sm:$0xff] }
 0xff5   :  { %v2628_v63 = vpop.xlane.xlu1 %2627 }
 0xff6   :  { %v2637_v39 = vrot.slane %v2628_v63, %v4323_v54 }
 0xff7   :  { %v2631_v43 = vpop.xlane.xlu0 %2630 }
 0xff8   :  { %v2641_v40 = vrot.slane %v2631_v43, %v4323_v54 }
 0xffa   :  { %v2642_v8 = vsel %vm606_vm3, %v2641_v40, %v2637_v39  ;;  %v3987_v39 = vld [vmem:[#allocation8 + $0xd0] sm:$0xff] }
 0xffb   :  { %v2644_v12 = vsel %vm609_vm4, %v2642_v8, -inf  ;;  %v3988_v40 = vld [vmem:[#allocation8 + $0xf0] sm:$0xff]  ;;  %v3989_v8 = vld [vmem:[#allocation8 + $0xc8] sm:$0xff] }
 0xffc   :  { %2645 = vmax.xlane.f32.xlu1 %v2644_v12  ;;  %v3990_v12 = vld [vmem:[#allocation8 + $0xe8] sm:$0xff] }
0x1085   :  { %v2646_v15 = vpop.xlane.xlu1 %2645 }
0x1086   :  { %v2651_v10 = vrot.slane %v2646_v15, %v4288_v26  ;;  %v2655_v45 = vrot.slane %v2646_v15, %v4312_v44  ;;  %v3991_v15 = vld [vmem:[#allocation8 + $0xc0] sm:$0xff] }
0x1088   :  { %v2658_v52 = vsub.f32 %v2628_v63, %v2651_v10  ;;  %v2659_v1 = vsub.f32 %v2631_v43, %v2655_v45  ;;  %v3985_v63 = vld [vmem:[#allocation8 + $0xd8] sm:$0xff]  ;;  %v3992_v10 = vld [vmem:[#allocation8 + $0xe0] sm:$0xff]  ;;  %v3203_v45 = vld [vmem:[#allocation11 + $0x18] sm:$0xff] }
0x1089   :  { %v3986_v43 = vld [vmem:[#allocation8 + $0xf8] sm:$0xff] }
0x108a   :  { %v2660_v14 = vmul.f32 1.442695, %v2658_v52  ;;  %v2662_v5 = vmul.f32 1.442695, %v2659_v1  ;;  %v3202_v52 = vld [vmem:[#allocation11 + $0x10] sm:$0xff]  ;;  %v3201_v1 = vld [vmem:[#allocation11 + $0x8] sm:$0xff] }
0x108c   :  { %3947 = vpow2.f32 %v2660_v14  ;;  %v3200_v14 = vld [vmem:[#allocation11] sm:$0xff] }
0x108d   :  { %3949 = vpow2.f32 %v2662_v5 }
0x1099   :  { %v3948_v51 = vpop.eup %3947 }
0x109a   :  { %v3950_v58 = vpop.eup %3949  ;;  %2667 = vperm.xlu1 %3881, %v3948_v51  }
0x109b   :  { %2670 = vperm.xlu0 %3882, %v3950_v58  }
0x1115   :  { %v2668_v61 = vpop.permute.xlu1 %2667 }
0x1116   :  { %v2671_v25 = vpop.permute.xlu0 %2670  ;;  %v2675_v60 = vrot.slane %v2668_v61, %v4323_v54 }
0x1117   :  { %v2679_v16 = vrot.slane %v2671_v25, %v4323_v54 }
0x1119   :  { %v2680_v47 = vsel %vm606_vm3, %v2679_v16, %v2675_v60 }
0x111a   :  { %v2682_v36 = vsel %vm609_vm4, %v2680_v47, 0.0 }
0x111b   :  { %2683 = vadd.xlane.f32.xlu1 %v2682_v36 }
0x11a4   :  { %v2684_v56 = vpop.xlane.xlu1 %2683 }
0x11a5   :  { %3951 = vrcp.f32 %v2684_v56 }
0x11b2   :  { %v3952_v50 = vpop.eup %3951 }
0x11b3   :  { %v2690_v29 = vrot.slane %v3952_v50, %v4288_v26  ;;  %v2694_v38 = vrot.slane %v3952_v50, %v4312_v44 }
0x11b5   :  { %v2697_v33 = vmul.f32 %v3948_v51, %v2690_v29  ;;  %v2698_v57 = vmul.f32 %v3950_v58, %v2694_v38 }
0x11b7   :  { %2701 = vperm.xlu0 %3882, %v2697_v33  }
0x11bb   :  { %2706 = vperm.xlu0 %3882, %v2698_v57  }
0x1232   :  { %v2702_v41 = vpop.permute.xlu0 %2701 }
0x1233   :  { %v2709_v2 = vmul.f32 %v4675_v34, %v2702_v41 }
0x1235   :  { %v2711_v54 = vsel %vm156_vm2, %v2709_v2, 0.0 }
0x1236   :  { %v2712_v7 = vrot.slane %v2711_v54, 4  ;;  %v2707_v35 = vpop.permute.xlu0 %2706 }
0x1237   :  { %v2710_v62 = vmul.f32 %v4672_v48, %v2707_v35  ;;  %v3977_v48 = vld [vmem:[#allocation8 + $0x98] sm:$0xff] }
0x1238   :  { %v2713_v59 = vadd.f32 %v2712_v7, %v2711_v54 }
0x1239   :  { %v2718_v37 = vsel %vm156_vm2, %v2710_v62, 0.0 }
0x123a   :  { %v2714_v9 = vrot.slane %v2713_v59, 2  ;;  %v2719_v26 = vrot.slane %v2718_v37, 4 }
0x123c   :  { %v2715_v11 = vadd.f32 %v2714_v9, %v2713_v59  ;;  %v2720_v18 = vadd.f32 %v2719_v26, %v2718_v37 }
0x123e   :  { %v2721_v44 = vrot.slane %v2720_v18, 2  ;;  %v2716_v19 = vrot.slane %v2715_v11, 1 }
0x1240   :  { %v2722_v3 = vadd.f32 %v2721_v44, %v2720_v18  ;;  %v2717_v21 = vadd.f32 %v2716_v19, %v2715_v11 }
0x1242   :  { %v2723_v20 = vrot.slane %v2722_v3, 1 }
0x1244   :  { %v2724_v23 = vadd.f32 %v2723_v20, %v2722_v3 }
0x1246   :  { %v2727_v34 = vsel %vm606_vm3, %v2724_v23, %v2717_v21  ;;  %v3190_v21 = vrot.slane %v4753_v13, 6 }
0x1247   :  { %3800 = vmatmul.mubr.msk.f32.vlgmr.msra.gmra.mxu1 %vm156_vm2, %v2727_v34  ;;  %3811 = vmatmul.mubr.msk.f32.vlgmr.msra.gmra.mxu0 %vm156_vm2, %v2727_v34 }
0x1248   :  { %3814 = vmatpush3.msra.mxu1 %v3977_v48  ;;  %3825 = vmatpush3.msra.mxu0 %v3978_v24 }
0x1249   :  { %3815 = vmatprep.subr.mxu1 %v4151_v0  ;;  %3826 = vmatprep.subr.mxu0 %v4151_v0 }
0x124a   :  { %3816 = vmatpush3.msra.mxu1 %v3979_v28  ;;  %3827 = vmatpush3.msra.mxu0 %v3980_v42 }
0x124b   :  { %3817 = vmatprep.subr.mxu1 %v4151_v0  ;;  %3828 = vmatprep.subr.mxu0 %v4151_v0 }
0x124c   :  { %3818 = vmatpush3.msra.mxu1 %v3981_v30  ;;  %3829 = vmatpush3.msra.mxu0 %v3982_v31 }
0x124d   :  { %3819 = vmatprep.subr.mxu1 %v4151_v0  ;;  %3830 = vmatprep.subr.mxu0 %v4151_v0 }
0x124e   :  { %3820 = vmatpush3.msra.mxu1 %v3983_v32  ;;  %3821 = vmatprep.mubr.msk.f32.mxu1 %vm4152_vm0, %v4151_v0 }
0x124f   :  { %3831 = vmatpush3.msra.mxu0 %v3984_v27  ;;  %3832 = vmatprep.mubr.msk.f32.mxu0 %vm4152_vm0, %v4151_v0 }
0x1250   :  { %3822 = vmatmul.mubr.msk.f32.vlgmr.msra.gmra.mxu1 %vm156_vm2, %v2727_v34  ;;  %3833 = vmatmul.mubr.msk.f32.vlgmr.msra.gmra.mxu0 %vm156_vm2, %v4758_v4 }
0x1251   :  { %3835 = vmatprep.subr.mxu1 %v4151_v0  ;;  %3846 = vmatprep.subr.mxu0 %v4151_v0 }
0x1252   :  { %3836 = vmatpush3.msra.mxu1 %v3985_v63  ;;  %3847 = vmatpush3.msra.mxu0 %v3986_v43 }
0x1253   :  { %3837 = vmatprep.subr.mxu1 %v4151_v0  ;;  %3848 = vmatprep.subr.mxu0 %v4151_v0 }
0x1254   :  { %3838 = vmatpush3.msra.mxu1 %v3987_v39  ;;  %3849 = vmatpush3.msra.mxu0 %v3988_v40 }
0x1255   :  { %3839 = vmatprep.subr.mxu1 %v4151_v0  ;;  %3850 = vmatprep.subr.mxu0 %v4151_v0 }
0x1256   :  { %3840 = vmatpush3.msra.mxu1 %v3989_v8  ;;  %3851 = vmatpush3.msra.mxu0 %v3990_v12 }
0x1257   :  { %3841 = vmatprep.subr.mxu1 %v4151_v0  ;;  %3852 = vmatprep.subr.mxu0 %v4151_v0 }
0x1258   :  { %3842 = vmatpush3.msra.mxu1 %v3991_v15  ;;  %3843 = vmatprep.mubr.msk.f32.mxu1 %vm4152_vm0, %v4151_v0 }
0x1259   :  { %3853 = vmatpush3.msra.mxu0 %v3992_v10  ;;  %3854 = vmatprep.mubr.msk.f32.mxu0 %vm4152_vm0, %v4151_v0 }
0x125a   :  { %3844 = vmatmul.mubr.msk.f32.vlgmr.msra.gmra.mxu1 %vm156_vm2, %v4758_v4  ;;  %3855 = vmatmul.mubr.msk.f32.vlgmr.msra.gmra.mxu0 %vm156_vm2, %v4758_v4 }
0x125b   :  { %3857 = vmatprep.subr.mxu1 %v4151_v0  ;;  %3865 = vmatprep.mubr.msk.f32.mxu1 %vm4152_vm0, %v4151_v0 }
0x125c   :  { %3858 = vmatpush3.msra.mxu1 %v3203_v45 }
0x125d   :  { %3859 = vmatprep.subr.mxu1 %v4151_v0 }
0x125e   :  { %3860 = vmatpush3.msra.mxu1 %v3202_v52 }
0x125f   :  { %3861 = vmatprep.subr.mxu1 %v4151_v0 }
0x1260   :  { %3862 = vmatpush3.msra.mxu1 %v3201_v1 }
0x1261   :  { %3863 = vmatprep.subr.mxu1 %v4151_v0 }
0x1262   :  { %3864 = vmatpush3.msra.mxu1 %v3200_v14 }
0x1307   :  { %v2796_v4 = vpop.f32.mrf.mxu1  ;;  %v2870_v5 = vpop.f32.mrf.mxu0 }
0x1308   :  { %v2801_v61 = vrot.slane %v2796_v4, 2  ;;  %v2875_v38 = vrot.slane %v2870_v5, 2 }
0x1309   :  { %v3801_v51 = vpop.f32.mrf.mxu1  ;;  %v3812_v58 = vpop.f32.mrf.mxu0 }
0x130a   :  { %v2803_v56 = vadd.f32 %v2801_v61, %v4488_v55  ;;  %v2877_v7 = vadd.f32 %v2875_v38, %v4499_v17 }
0x1310   :  { %v2944_v25 = vpop.f32.mrf.mxu1  ;;  %v3018_v60 = vpop.f32.mrf.mxu0 }
0x1311   :  { %v3019_v16 = vadd.f32 %v3018_v60, %v4485_v53  ;;  %v2949_v26 = vrot.slane %v2944_v25, 2 }
0x1312   :  { %v3823_v47 = vpop.f32.mrf.mxu1  ;;  %v3834_v36 = vpop.f32.mrf.mxu0 }
0x1313   :  { %v3163_v50 = vrot.slane %v3019_v16, 2 }
0x1315   :  { %v3165_v29 = vadd.f32 %v3163_v50, %v2803_v56 }
0x1317   :  { %v3353_v33 = vmul.f32 -1.442695, %v3165_v29 }
0x1319   :  { %3953 = vpow2.f32 %v3353_v33 }
0x131a   :  { %v3088_v0 = vpop.f32.mrf.mxu1  ;;  %v3158_v57 = vpop.f32.mrf.mxu0 }
0x131b   :  { %v3089_v41 = vadd.f32 %v3088_v0, %v4496_v46  ;;  %v3159_v9 = vadd.f32 %v3158_v57, %v4506_v22  ;;  %v2951_v46 = vadd.f32 %v2949_v26, %v4510_v49  ;;  %v3355_v49 = vld [vmem:[%s4858_s7] ss:$0 sm:$0xff]  ;;  %s4113_s7 = scalar_lea.vmem %s3303_s13, 128 }
0x131c   :  { %v3845_v2 = vpop.f32.mrf.mxu1  ;;  %v3856_v54 = vpop.f32.mrf.mxu0  ;;  %p4114_p2 = scmp.ne.s32.totalorder %s3303_s13, %s4113_s7  ;;  %p4119_p4 = scmp.lt.s32.totalorder %s4113_s7, %s4113_s7 }
0x131d   :  { %v3173_v35 = vrot.slane %v3089_v41, 2  ;;  %v3183_v18 = vrot.slane %v3159_v9, 2 }
0x131e   :  { %p4120_p5 = por %p4119_p4, %p4118_p3 }
0x131f   :  { %v3175_v62 = vadd.f32 %v3173_v35, %v2877_v7 }
0x1320   :  { %p4121_p6 = pnand %p4120_p5, %p4114_p2 }
0x1321   :  { %v3354_v53 = vmul.f32 -1.442695, %v3175_v62 }
0x1323   :  { %3955 = vpow2.f32 %v3354_v53 }
0x1326   :  { %v3954_v59 = vpop.eup %3953 }
0x1327   :  { %v3169_v37 = vadd.f32 1.0, %v3954_v59 }
0x1329   :  { %3957 = vrcp.f32 %v3169_v37 }
0x1330   :  { %v3956_v55 = vpop.eup %3955 }
0x1331   :  { %v3179_v11 = vadd.f32 1.0, %v3956_v55 }
0x1333   :  { %3959 = vrcp.f32 %v3179_v11 }
0x1336   :  { %v3958_v44 = vpop.eup %3957 }
0x1337   :  { %v3185_v19 = vmul.f32 %v3958_v44, %v3183_v18 }
0x1339   :  { %v3186_v3 = vadd.f32 %v3185_v19, %v2951_v46 }
0x133b   :  { %3961 = vtanh.f32 %v3186_v3 }
0x1340   :  { %v3960_v17 = vpop.eup %3959 }
0x1341   :  { %v3188_v20 = vsub.f32 1.0, %v3960_v17  ;;  %v3192_v48 = vmul.f32 %v3960_v17, %v3190_v21 }
0x1348   :  { %v3962_v23 = vpop.eup %3961 }
0x1349   :  { %v3189_v34 = vmul.f32 %v3962_v23, %v3188_v20 }
0x134b   :  { %v3193_v24 = vadd.f32 %v3192_v48, %v3189_v34 }
0x134d   :  { %v3199_v22 = vsel %vm3198_vm7, %v4761_v6, %v3193_v24 }
0x134e   :  { %3866 = vmatmul.mubr.msk.f32.vlgmr.msra.gmra.mxu1 %vm156_vm2, %v3199_v22 }
0x140e   :  { %v3280_v28 = vpop.f32.mrf.mxu1 }
0x140f   :  { %v3281_v42 = vadd.f32 %v3355_v49, %v3280_v28 }
0x1410   :  { %v3867_v30 = vpop.f32.mrf.mxu1 }
0x1411   :  { %3284 = vmax.xlane.f32.xlu0 %v3281_v42 }
0x149a   :  { %v3285_v31 = vpop.xlane.xlu0 %3284 }
0x149b   :  { %v3286_v32 = vsub.f32 %v3281_v42, %v3285_v31 }
0x149d   :  { %v3287_v13 = vmul.f32 1.442695, %v3286_v32 }
0x149f   :  { %3963 = vpow2.f32 %v3287_v13 }
0x14ac   :  { %v3964_v27 = vpop.eup %3963 }
0x14ad   :  { %3289 = vadd.xlane.f32.xlu1 %v3964_v27 }
0x1536   :  { %v3290_v63 = vpop.xlane.xlu1 %3289 }
0x1537   :  { %3965 = vlog2.f32 %v3290_v63 }
0x1544   :  { %v3966_v43 = vpop.eup %3965 }
0x1545   :  { %v3292_v6 = vmul.f32 0.6931472, %v3966_v43 }
0x1547   :  { %v3293_v39 = vadd.f32 %v3292_v6, %v3285_v31 }
0x1549   :  { %v3294_v40 = vsub.f32 %v3281_v42, %v3293_v39 }
0x154b   :  { %3295 = vst [vmem:[#allocation13] sm:$0xff] %v3294_v40 }
0x154c   :  { %4124 = shalt.err (!%p4121_p6)
}
0x154d   :  { %3305 = dma.vmem_to_hbm [thread:$0]  %s3303_s13, 128, %s4859_s8, [#allocation4]  }
0x154e   :  { %4141 = dma.done.wait [#allocation4], 128  }
0x154f   :  { %4142 = vsyncadd [#allocation4], 4294967168 }
0x1550   :  { %3309 = vsyncpa [#allocation3], 1 }
0x1551   :  { %3310 = vsyncpa [#allocation6], 1 }
0x1552   :  { %3311 = vsyncpa [#allocation9], 1 }
0x1553   :  { %3312 = vsyncpa [#allocation12], 1 }
0x1554   :  { %3313 = vsyncpa [#allocation4], 1 }

</bundles_post_ra>
